<compile_context>
chip_gen: v5e
topology: v5e:2x2
jax: 0.10.0
libtpu: 0.0.40
codegen_flags: <defaults>
</compile_context>

<pallas_src>
import math

import jax
import jax.numpy as jnp
from jax.experimental import pallas as pl
from jax.experimental.pallas import tpu as pltpu

# ---- synthetic "BERT" config (small) ----------------------------------------
BATCH = 2
SEQ = 8
HIDDEN = 32
NUM_HEADS = 4
HEAD_DIM = HIDDEN // NUM_HEADS
INTERMEDIATE = 64
NUM_LAYERS = 2
VOCAB = 64
MAX_POS = 32
NUM_LABELS = 5              # len(labels) of the NER tag set
LANES = 128                 # lane-dense padded classifier width
IGNORE_INDEX = -100         # PyTorch CrossEntropyLoss ignore_index
LN_EPS = 1e-12


# ---- in-kernel helpers (f32 elementwise math) --------------------------------
def _layernorm(h, g, b):
    mu = jnp.mean(h, axis=-1, keepdims=True)
    var = jnp.mean((h - mu) ** 2, axis=-1, keepdims=True)
    return (h - mu) * jax.lax.rsqrt(var + LN_EPS) * g + b


def _gelu(x):
    # TODO(synk): HF BERT default is exact (erf) GELU; tanh approximation used
    # for robust TPU lowering.
    return 0.5 * x * (1.0 + jnp.tanh(0.7978845608028654 * (x + 0.044715 * x * x * x)))


# ---- single fused kernel: all encoder layers + classifier + CE loss ----------
def fused_bert_kernel(x_ref, bias_ref, labels_ref, embg_ref, embb_ref,
                      wqkv_ref, bqkv_ref, wo_ref, bo_ref, ln1g_ref, ln1b_ref,
                      wi_ref, bi_ref, wd_ref, bd_ref, ln2g_ref, ln2b_ref,
                      wc_ref, bc_ref,
                      logits_ref, losspart_ref,
                      h_ref):
    l = pl.program_id(1)

    # First layer step for this batch element: embedding LayerNorm (fused in)
    # feeds the VMEM-resident activation carry.
    @pl.when(l == 0)
    def _():
        h_ref[...] = _layernorm(x_ref[...], embg_ref[...], embb_ref[...])

    x = h_ref[...]                                     # (S, H) f32
    x_bf = x.astype(jnp.bfloat16)

    # ---- fused QKV projection: one MXU matmul instead of three --------------
    qkv = jnp.dot(x_bf, wqkv_ref[...],
                  preferred_element_type=jnp.float32) + bqkv_ref[...]
    q = qkv[:, 0 * HIDDEN:1 * HIDDEN]                  # 1/sqrt(head_dim) folded into wq
    k = qkv[:, 1 * HIDDEN:2 * HIDDEN]
    v = qkv[:, 2 * HIDDEN:3 * HIDDEN]

    # (S, H) -> head-major (NH, S, HD) via static lane slices + leading-axis
    # stack; heads then contract in a single batched einsum pair.
    def to_heads(t):
        return jnp.stack(
            [t[:, h * HEAD_DIM:(h + 1) * HEAD_DIM] for h in range(NUM_HEADS)],
            axis=0)

    qh = to_heads(q).astype(jnp.bfloat16)
    kh = to_heads(k).astype(jnp.bfloat16)
    vh = to_heads(v).astype(jnp.bfloat16)

    s = jnp.einsum('hqd,hkd->hqk', qh, kh,
                   preferred_element_type=jnp.float32)         # (NH, S, S) f32
    s = s + bias_ref[...][None, :, :]                          # key-padding bias
    s = s - jnp.max(s, axis=-1, keepdims=True)
    p = jnp.exp(s)
    p = p * pl.reciprocal(jnp.sum(p, axis=-1, keepdims=True), approx=True)
    ctx = jnp.einsum('hqk,hkd->hqd', p.astype(jnp.bfloat16), vh,
                     preferred_element_type=jnp.float32)       # (NH, S, HD) f32
    ctx2d = jnp.concatenate([ctx[h] for h in range(NUM_HEADS)], axis=-1)  # (S, H)

    # attention output projection + residual + LayerNorm
    attn = jnp.dot(ctx2d.astype(jnp.bfloat16), wo_ref[...],
                   preferred_element_type=jnp.float32) + bo_ref[...]
    h1 = _layernorm(x + attn, ln1g_ref[...], ln1b_ref[...])

    # feed-forward + residual + LayerNorm
    inter = _gelu(jnp.dot(h1.astype(jnp.bfloat16), wi_ref[...],
                          preferred_element_type=jnp.float32) + bi_ref[...])
    ffn = jnp.dot(inter.astype(jnp.bfloat16), wd_ref[...],
                  preferred_element_type=jnp.float32) + bd_ref[...]
    h2 = _layernorm(h1 + ffn, ln2g_ref[...], ln2b_ref[...])

    h_ref[...] = h2

    # ---- last layer: classifier head + token-level cross-entropy ------------
    @pl.when(l == NUM_LAYERS - 1)
    def _():
        # lane-dense (S, 128) logits slab; padding columns carry a -1e9 bias so
        # they never influence max / logsumexp.
        logits = jnp.dot(h2.astype(jnp.bfloat16), wc_ref[...],
                         preferred_element_type=jnp.float32) + bc_ref[...]
        logits_ref[...] = logits

        labels = labels_ref[...]                               # (S, 1) int32
        classes = jax.lax.broadcasted_iota(jnp.int32, (SEQ, LANES), 1)
        onehot = (classes == labels).astype(jnp.float32)       # -100 never matches

        m = jnp.max(logits, axis=-1, keepdims=True)
        lse = jnp.log(jnp.sum(jnp.exp(logits - m), axis=-1, keepdims=True)) + m
        logp = logits - lse
        picked = jnp.sum(onehot * logp, axis=-1, keepdims=True)      # (S, 1)
        valid = (labels != IGNORE_INDEX).astype(jnp.float32)         # (S, 1)

        numer = jnp.sum(picked * valid)
        denom = jnp.sum(valid)

        # per-batch loss partials in one lane-dense row:
        # lane 0 = sum of picked log-probs, lane 1 = number of valid tokens.
        col = jax.lax.broadcasted_iota(jnp.int32, (1, LANES), 1)
        losspart_ref[...] = jnp.where(
            col == 0, numer, jnp.where(col == 1, denom, 0.0))


# ---- wrapper -----------------------------------------------------------------
def _fused_call(x_emb, attn_bias, labels3d, P):
    H, I = HIDDEN, INTERMEDIATE

    per_batch = lambda b, l: (b, 0, 0)
    per_layer = lambda b, l: (l, 0, 0)
    shared2d = lambda b, l: (0, 0)

    in_specs = [
        pl.BlockSpec((None, SEQ, H), per_batch),          # embedded input (pre-LN)
        pl.BlockSpec((None, 1, SEQ), per_batch),          # additive attention bias
        pl.BlockSpec((None, SEQ, 1), per_batch),          # labels
        pl.BlockSpec((1, H), shared2d),                   # embedding LN gamma
        pl.BlockSpec((1, H), shared2d),                   # embedding LN beta
        pl.BlockSpec((None, H, 3 * H), per_layer),        # wqkv (bf16)
        pl.BlockSpec((None, 1, 3 * H), per_layer),        # bqkv
        pl.BlockSpec((None, H, H), per_layer),            # wo (bf16)
        pl.BlockSpec((None, 1, H), per_layer),            # bo
        pl.BlockSpec((None, 1, H), per_layer),            # ln1 gamma
        pl.BlockSpec((None, 1, H), per_layer),            # ln1 beta
        pl.BlockSpec((None, H, I), per_layer),            # wi (bf16)
        pl.BlockSpec((None, 1, I), per_layer),            # bi
        pl.BlockSpec((None, I, H), per_layer),            # wd (bf16)
        pl.BlockSpec((None, 1, H), per_layer),            # bd
        pl.BlockSpec((None, 1, H), per_layer),            # ln2 gamma
        pl.BlockSpec((None, 1, H), per_layer),            # ln2 beta
        pl.BlockSpec((H, LANES), shared2d),               # classifier W (padded, bf16)
        pl.BlockSpec((1, LANES), shared2d),               # classifier b (padded)
    ]
    out_specs = [
        pl.BlockSpec((None, SEQ, LANES), per_batch),      # lane-dense logits
        pl.BlockSpec((None, 1, LANES), per_batch),        # per-batch loss partials
    ]
    out_shape = (
        jax.ShapeDtypeStruct((BATCH, SEQ, LANES), jnp.float32),
        jax.ShapeDtypeStruct((BATCH, 1, LANES), jnp.float32),
    )
    return pl.pallas_call(
        fused_bert_kernel,
        out_shape=out_shape,
        grid_spec=pltpu.PrefetchScalarGridSpec(
            num_scalar_prefetch=0,
            grid=(BATCH, NUM_LAYERS),
            in_specs=in_specs,
            out_specs=out_specs,
            scratch_shapes=[pltpu.VMEM((SEQ, HIDDEN), jnp.float32)],  # activation carry
        ),
        compiler_params=pltpu.CompilerParams(
            dimension_semantics=("parallel", "arbitrary")),
    )(x_emb, attn_bias, labels3d,
      P['emb_ln_g'], P['emb_ln_b'],
      P['wqkv'], P['bqkv'], P['wo'], P['bo'], P['ln1g'], P['ln1b'],
      P['wi'], P['bi'], P['wd'], P['bd'], P['ln2g'], P['ln2b'],
      P['wc_pad'], P['bc_pad'])


# ---- deterministic parameter init (synthetic weights, NOT a checkpoint) ------
def init_params(key):
    ks = iter(jax.random.split(key, 16))

    def w(shape):
        return jax.random.normal(next(ks), shape, jnp.float32) * 0.02

    L, H, I = NUM_LAYERS, HIDDEN, INTERMEDIATE
    bf16 = jnp.bfloat16
    scale = 1.0 / math.sqrt(HEAD_DIM)

    # fused QKV weight; 1/sqrt(head_dim) folded into wq (and its zero bias).
    wq = w((L, H, H)) * scale
    wk = w((L, H, H))
    wv = w((L, H, H))
    wqkv = jnp.concatenate([wq, wk, wv], axis=-1)          # (L, H, 3H)
    bqkv = jnp.zeros((L, 1, 3 * H), jnp.float32)

    # lane-dense padded classifier: zero weight columns, -1e9 bias columns so
    # padding lanes never win the softmax / logsumexp.
    wc = w((H, NUM_LABELS))
    wc_pad = jnp.zeros((H, LANES), jnp.float32).at[:, :NUM_LABELS].set(wc)
    bc_pad = jnp.full((1, LANES), -1e9, jnp.float32).at[:, :NUM_LABELS].set(0.0)

    return {
        'word_emb': w((VOCAB, H)),
        'pos_emb': w((MAX_POS, H)),
        'type_emb': w((2, H)),
        'emb_ln_g': jnp.ones((1, H), jnp.float32),
        'emb_ln_b': jnp.zeros((1, H), jnp.float32),
        # encoder weights stacked over layers; matmul weights stored in bf16
        'wqkv': wqkv.astype(bf16), 'bqkv': bqkv,
        'wo': w((L, H, H)).astype(bf16), 'bo': jnp.zeros((L, 1, H), jnp.float32),
        'ln1g': jnp.ones((L, 1, H), jnp.float32),
        'ln1b': jnp.zeros((L, 1, H), jnp.float32),
        'wi': w((L, H, I)).astype(bf16), 'bi': jnp.zeros((L, 1, I), jnp.float32),
        'wd': w((L, I, H)).astype(bf16), 'bd': jnp.zeros((L, 1, H), jnp.float32),
        'ln2g': jnp.ones((L, 1, H), jnp.float32),
        'ln2b': jnp.zeros((L, 1, H), jnp.float32),
        'wc_pad': wc_pad.astype(bf16), 'bc_pad': bc_pad,
    }


# ---- full forward: mirrors NERModel.forward (return_dict=False -> (loss, logits))
def ner_forward(params, input_ids, attention_mask, labels):
    B, S = input_ids.shape
    # embedding gather (JAX glue; dropout omitted = eval mode); the embedding
    # LayerNorm runs inside the fused kernel at layer step 0.
    emb = (params['word_emb'][input_ids]
           + params['pos_emb'][:S][None, :, :]
           + params['type_emb'][0][None, None, :]).astype(jnp.float32)

    # additive attention bias computed once for all layers (hoisted out of kernel)
    attn_bias = ((1.0 - attention_mask.astype(jnp.float32)) * (-1e9)).reshape(B, 1, S)
    labels3d = labels.reshape(B, S, 1).astype(jnp.int32)

    logits_pad, losspart = _fused_call(emb, attn_bias, labels3d, params)

    logits = logits_pad[:, :, :NUM_LABELS]
    numer = jnp.sum(losspart[:, 0, 0])
    denom = jnp.sum(losspart[:, 0, 1])
    # TODO(synk): PyTorch CrossEntropyLoss returns NaN when every label is
    # ignore_index; we clamp the denominator to 1 instead.
    loss = -numer / jnp.maximum(denom, 1.0)
    return loss, logits


if __name__ == "__main__":
    key = jax.random.PRNGKey(0)
    pkey, ikey, lkey = jax.random.split(key, 3)

    params = init_params(pkey)
    input_ids = jax.random.randint(ikey, (BATCH, SEQ), 0, VOCAB, dtype=jnp.int32)
    attention_mask = jnp.ones((BATCH, SEQ), jnp.int32).at[1, SEQ - 2:].set(0)
    labels = jax.random.randint(lkey, (BATCH, SEQ), 0, NUM_LABELS, dtype=jnp.int32)
    labels = labels.at[1, SEQ - 2:].set(IGNORE_INDEX)   # padded tokens ignored in CE

    loss, logits = ner_forward(params, input_ids, attention_mask, labels)
    jax.block_until_ready((loss, logits))

    assert logits.shape == (BATCH, SEQ, NUM_LABELS), logits.shape
    assert bool(jnp.isfinite(loss)), "loss not finite"
    assert bool(jnp.all(jnp.isfinite(logits))), "logits not finite"
    print("KERNEL_OK")
</pallas_src>

<mosaic_0001>
module attributes {stable_mosaic.version = 11 : i64} {
  func.func @fused_bert_kernel(%arg0: i32, %arg1: i32, %arg2: memref<1x8x32xf32, #tpu.memory_space<vmem>>, %arg3: memref<1x1x8xf32, #tpu.memory_space<vmem>>, %arg4: memref<1x8x1xi32, #tpu.memory_space<vmem>>, %arg5: memref<1x32xf32, #tpu.memory_space<vmem>>, %arg6: memref<1x32xf32, #tpu.memory_space<vmem>>, %arg7: memref<1x32x96xbf16, #tpu.memory_space<vmem>>, %arg8: memref<1x1x96xf32, #tpu.memory_space<vmem>>, %arg9: memref<1x32x32xbf16, #tpu.memory_space<vmem>>, %arg10: memref<1x1x32xf32, #tpu.memory_space<vmem>>, %arg11: memref<1x1x32xf32, #tpu.memory_space<vmem>>, %arg12: memref<1x1x32xf32, #tpu.memory_space<vmem>>, %arg13: memref<1x32x64xbf16, #tpu.memory_space<vmem>>, %arg14: memref<1x1x64xf32, #tpu.memory_space<vmem>>, %arg15: memref<1x64x32xbf16, #tpu.memory_space<vmem>>, %arg16: memref<1x1x32xf32, #tpu.memory_space<vmem>>, %arg17: memref<1x1x32xf32, #tpu.memory_space<vmem>>, %arg18: memref<1x1x32xf32, #tpu.memory_space<vmem>>, %arg19: memref<32x128xbf16, #tpu.memory_space<vmem>>, %arg20: memref<1x128xf32, #tpu.memory_space<vmem>>, %arg21: memref<1x8x128xf32, #tpu.memory_space<vmem>>, %arg22: memref<1x1x128xf32, #tpu.memory_space<vmem>>, %arg23: memref<8x32xf32, #tpu.memory_space<vmem>>) attributes {dimension_semantics = [#tpu.dimension_semantics<parallel>, #tpu.dimension_semantics<arbitrary>], iteration_bounds = array<i64: 2, 2>, scalar_prefetch = 0 : i64, scratch_operands = 1 : i64, tpu.core_type = #tpu.core_type<tc>, window_params = [{transform_indices = @transform_0, window_bounds = array<i64: 1, 8, 32>}, {transform_indices = @transform_1, window_bounds = array<i64: 1, 1, 8>}, {transform_indices = @transform_2, window_bounds = array<i64: 1, 8, 1>}, {pipeline_mode = #tpu.pipeline_mode<synchronous>, transform_indices = @transform_3, window_bounds = array<i64: 1, 32>}, {pipeline_mode = #tpu.pipeline_mode<synchronous>, transform_indices = @transform_4, window_bounds = array<i64: 1, 32>}, {transform_indices = @transform_5, window_bounds = array<i64: 1, 32, 96>}, {transform_indices = @transform_6, window_bounds = array<i64: 1, 1, 96>}, {transform_indices = @transform_7, window_bounds = array<i64: 1, 32, 32>}, {transform_indices = @transform_8, window_bounds = array<i64: 1, 1, 32>}, {transform_indices = @transform_9, window_bounds = array<i64: 1, 1, 32>}, {transform_indices = @transform_10, window_bounds = array<i64: 1, 1, 32>}, {transform_indices = @transform_11, window_bounds = array<i64: 1, 32, 64>}, {transform_indices = @transform_12, window_bounds = array<i64: 1, 1, 64>}, {transform_indices = @transform_13, window_bounds = array<i64: 1, 64, 32>}, {transform_indices = @transform_14, window_bounds = array<i64: 1, 1, 32>}, {transform_indices = @transform_15, window_bounds = array<i64: 1, 1, 32>}, {transform_indices = @transform_16, window_bounds = array<i64: 1, 1, 32>}, {pipeline_mode = #tpu.pipeline_mode<synchronous>, transform_indices = @transform_17, window_bounds = array<i64: 32, 128>}, {pipeline_mode = #tpu.pipeline_mode<synchronous>, transform_indices = @transform_18, window_bounds = array<i64: 1, 128>}, {transform_indices = @transform_19, window_bounds = array<i64: 1, 8, 128>}, {transform_indices = @transform_20, window_bounds = array<i64: 1, 1, 128>}]} {
    %c0_i32 = arith.constant 0 : i32
    %0 = arith.cmpi eq, %arg1, %c0_i32 : i32
    %1 = arith.extui %0 : i1 to i32
    %c0_i32_0 = arith.constant 0 : i32
    %2 = arith.cmpi ne, %1, %c0_i32_0 : i32
    scf.if %2 {
      %c0_65 = arith.constant 0 : index
      %c0_66 = arith.constant 0 : index
      %c0_67 = arith.constant 0 : index
      %167 = vector.load %arg2[%c0_65, %c0_66, %c0_67] : memref<1x8x32xf32, #tpu.memory_space<vmem>>, vector<1x8x32xf32>
      %168 = vector.shape_cast %167 : vector<1x8x32xf32> to vector<8x32xf32>
      %c0_68 = arith.constant 0 : index
      %c0_69 = arith.constant 0 : index
      %169 = vector.load %arg5[%c0_68, %c0_69] : memref<1x32xf32, #tpu.memory_space<vmem>>, vector<1x32xf32>
      %c0_70 = arith.constant 0 : index
      %c0_71 = arith.constant 0 : index
      %170 = vector.load %arg6[%c0_70, %c0_71] : memref<1x32xf32, #tpu.memory_space<vmem>>, vector<1x32xf32>
      %cst_72 = arith.constant dense<0.000000e+00> : vector<8xf32>
      %171 = vector.multi_reduction <add>, %168, %cst_72 [1] : vector<8x32xf32> to vector<8xf32>
      %172 = vector.shape_cast %171 : vector<8xf32> to vector<8x1xf32>
      %cst_73 = arith.constant 3.200000e+01 : f32
      %173 = vector.broadcast %cst_73 : f32 to vector<8x1xf32>
      %174 = arith.divf %172, %173 : vector<8x1xf32>
      %175 = vector.broadcast %174 : vector<8x1xf32> to vector<8x32xf32>
      %176 = arith.subf %168, %175 : vector<8x32xf32>
      %177 = arith.mulf %176, %176 : vector<8x32xf32>
      %cst_74 = arith.constant dense<0.000000e+00> : vector<8xf32>
      %178 = vector.multi_reduction <add>, %177, %cst_74 [1] : vector<8x32xf32> to vector<8xf32>
      %179 = vector.shape_cast %178 : vector<8xf32> to vector<8x1xf32>
      %cst_75 = arith.constant 3.200000e+01 : f32
      %180 = vector.broadcast %cst_75 : f32 to vector<8x1xf32>
      %181 = arith.divf %179, %180 : vector<8x1xf32>
      %182 = vector.broadcast %174 : vector<8x1xf32> to vector<8x32xf32>
      %183 = arith.subf %168, %182 : vector<8x32xf32>
      %cst_76 = arith.constant 9.99999996E-13 : f32
      %184 = vector.broadcast %cst_76 : f32 to vector<8x1xf32>
      %185 = arith.addf %181, %184 : vector<8x1xf32>
      %186 = math.rsqrt %185 : vector<8x1xf32>
      %187 = vector.broadcast %186 : vector<8x1xf32> to vector<8x32xf32>
      %188 = arith.mulf %183, %187 : vector<8x32xf32>
      %189 = vector.broadcast %169 : vector<1x32xf32> to vector<8x32xf32>
      %190 = arith.mulf %188, %189 : vector<8x32xf32>
      %191 = vector.broadcast %170 : vector<1x32xf32> to vector<8x32xf32>
      %192 = arith.addf %190, %191 : vector<8x32xf32>
      %c0_77 = arith.constant 0 : index
      %c0_78 = arith.constant 0 : index
      %193 = vector.load %arg23[%c0_77, %c0_78] : memref<8x32xf32, #tpu.memory_space<vmem>>, vector<8x32xf32>
      tpu.vector_store %arg23[%c0_77, %c0_78], %192 {strides = array<i32>} : memref<8x32xf32, #tpu.memory_space<vmem>>, vector<8x32xf32>,
    } else {
    }
    %c0 = arith.constant 0 : index
    %c0_1 = arith.constant 0 : index
    %3 = vector.load %arg23[%c0, %c0_1] : memref<8x32xf32, #tpu.memory_space<vmem>>, vector<8x32xf32>
    %4 = arith.truncf %3 : vector<8x32xf32> to vector<8x32xbf16>
    %c0_2 = arith.constant 0 : index
    %c0_3 = arith.constant 0 : index
    %c0_4 = arith.constant 0 : index
    %5 = vector.load %arg7[%c0_2, %c0_3, %c0_4] : memref<1x32x96xbf16, #tpu.memory_space<vmem>>, vector<1x32x96xbf16>
    %6 = vector.shape_cast %5 : vector<1x32x96xbf16> to vector<32x96xbf16>
    %cst = arith.constant dense<0.000000e+00> : vector<8x96xf32>
    %7 = tpu.matmul %4, %6, %cst {dimension_numbers = #tpu.dot_dimension_numbers<[1], [0], [0], [1], [0, 0, 1, 1], [], []>} : vector<8x32xbf16>, vector<32x96xbf16>, vector<8x96xf32> -> vector<8x96xf32>
    %c0_5 = arith.constant 0 : index
    %c0_6 = arith.constant 0 : index
    %c0_7 = arith.constant 0 : index
    %8 = vector.load %arg8[%c0_5, %c0_6, %c0_7] : memref<1x1x96xf32, #tpu.memory_space<vmem>>, vector<1x1x96xf32>
    %9 = vector.shape_cast %8 : vector<1x1x96xf32> to vector<1x96xf32>
    %10 = vector.broadcast %9 : vector<1x96xf32> to vector<8x96xf32>
    %11 = arith.addf %7, %10 : vector<8x96xf32>
    %12 = vector.extract_strided_slice %11 {offsets = [0, 0], sizes = [8, 32], strides = [1, 1]} : vector<8x96xf32> to vector<8x32xf32>
    %13 = vector.extract_strided_slice %11 {offsets = [0, 32], sizes = [8, 32], strides = [1, 1]} : vector<8x96xf32> to vector<8x32xf32>
    %14 = vector.extract_strided_slice %11 {offsets = [0, 64], sizes = [8, 32], strides = [1, 1]} : vector<8x96xf32> to vector<8x32xf32>
    %15 = vector.extract_strided_slice %12 {offsets = [0, 0], sizes = [8, 8], strides = [1, 1]} : vector<8x32xf32> to vector<8x8xf32>
    %16 = vector.extract_strided_slice %12 {offsets = [0, 8], sizes = [8, 8], strides = [1, 1]} : vector<8x32xf32> to vector<8x8xf32>
    %17 = vector.extract_strided_slice %12 {offsets = [0, 16], sizes = [8, 8], strides = [1, 1]} : vector<8x32xf32> to vector<8x8xf32>
    %18 = vector.extract_strided_slice %12 {offsets = [0, 24], sizes = [8, 8], strides = [1, 1]} : vector<8x32xf32> to vector<8x8xf32>
    %19 = vector.shape_cast %15 : vector<8x8xf32> to vector<1x8x8xf32>
    %20 = vector.shape_cast %16 : vector<8x8xf32> to vector<1x8x8xf32>
    %21 = vector.shape_cast %17 : vector<8x8xf32> to vector<1x8x8xf32>
    %22 = vector.shape_cast %18 : vector<8x8xf32> to vector<1x8x8xf32>
    %23 = tpu.concatenate %19, %20, %21, %22 in 0 : vector<1x8x8xf32>, vector<1x8x8xf32>, vector<1x8x8xf32>, vector<1x8x8xf32> -> vector<4x8x8xf32>
    %24 = arith.truncf %23 : vector<4x8x8xf32> to vector<4x8x8xbf16>
    %25 = vector.extract_strided_slice %13 {offsets = [0, 0], sizes = [8, 8], strides = [1, 1]} : vector<8x32xf32> to vector<8x8xf32>
    %26 = vector.extract_strided_slice %13 {offsets = [0, 8], sizes = [8, 8], strides = [1, 1]} : vector<8x32xf32> to vector<8x8xf32>
    %27 = vector.extract_strided_slice %13 {offsets = [0, 16], sizes = [8, 8], strides = [1, 1]} : vector<8x32xf32> to vector<8x8xf32>
    %28 = vector.extract_strided_slice %13 {offsets = [0, 24], sizes = [8, 8], strides = [1, 1]} : vector<8x32xf32> to vector<8x8xf32>
    %29 = vector.shape_cast %25 : vector<8x8xf32> to vector<1x8x8xf32>
    %30 = vector.shape_cast %26 : vector<8x8xf32> to vector<1x8x8xf32>
    %31 = vector.shape_cast %27 : vector<8x8xf32> to vector<1x8x8xf32>
    %32 = vector.shape_cast %28 : vector<8x8xf32> to vector<1x8x8xf32>
    %33 = tpu.concatenate %29, %30, %31, %32 in 0 : vector<1x8x8xf32>, vector<1x8x8xf32>, vector<1x8x8xf32>, vector<1x8x8xf32> -> vector<4x8x8xf32>
    %34 = arith.truncf %33 : vector<4x8x8xf32> to vector<4x8x8xbf16>
    %35 = vector.extract_strided_slice %14 {offsets = [0, 0], sizes = [8, 8], strides = [1, 1]} : vector<8x32xf32> to vector<8x8xf32>
    %36 = vector.extract_strided_slice %14 {offsets = [0, 8], sizes = [8, 8], strides = [1, 1]} : vector<8x32xf32> to vector<8x8xf32>
    %37 = vector.extract_strided_slice %14 {offsets = [0, 16], sizes = [8, 8], strides = [1, 1]} : vector<8x32xf32> to vector<8x8xf32>
    %38 = vector.extract_strided_slice %14 {offsets = [0, 24], sizes = [8, 8], strides = [1, 1]} : vector<8x32xf32> to vector<8x8xf32>
    %39 = vector.shape_cast %35 : vector<8x8xf32> to vector<1x8x8xf32>
    %40 = vector.shape_cast %36 : vector<8x8xf32> to vector<1x8x8xf32>
    %41 = vector.shape_cast %37 : vector<8x8xf32> to vector<1x8x8xf32>
    %42 = vector.shape_cast %38 : vector<8x8xf32> to vector<1x8x8xf32>
    %43 = tpu.concatenate %39, %40, %41, %42 in 0 : vector<1x8x8xf32>, vector<1x8x8xf32>, vector<1x8x8xf32>, vector<1x8x8xf32> -> vector<4x8x8xf32>
    %44 = arith.truncf %43 : vector<4x8x8xf32> to vector<4x8x8xbf16>
    "tpu.trace_start"() <{level = 10 : i32, message = "hqd,hkd->hqk"}> : () -> ()
    %cst_8 = arith.constant dense<0.000000e+00> : vector<4x8x8xf32>
    %45 = tpu.matmul %24, %34, %cst_8 {dimension_numbers = #tpu.dot_dimension_numbers<[2], [2], [1], [1], [0, 0, 0, 1, 1, 1], [0], [0]>} : vector<4x8x8xbf16>, vector<4x8x8xbf16>, vector<4x8x8xf32> -> vector<4x8x8xf32>
    "tpu.trace_stop"() : () -> ()
    %c0_9 = arith.constant 0 : index
    %c0_10 = arith.constant 0 : index
    %c0_11 = arith.constant 0 : index
    %46 = vector.load %arg3[%c0_9, %c0_10, %c0_11] : memref<1x1x8xf32, #tpu.memory_space<vmem>>, vector<1x1x8xf32>
    %47 = vector.shape_cast %46 : vector<1x1x8xf32> to vector<1x8xf32>
    %48 = vector.shape_cast %47 : vector<1x8xf32> to vector<1x1x8xf32>
    %49 = vector.broadcast %48 : vector<1x1x8xf32> to vector<4x8x8xf32>
    %50 = arith.addf %45, %49 : vector<4x8x8xf32>
    %cst_12 = arith.constant dense<0xFF800000> : vector<4x8xf32>
    %51 = vector.multi_reduction <maximumf>, %50, %cst_12 [2] : vector<4x8x8xf32> to vector<4x8xf32>
    %52 = vector.shape_cast %51 : vector<4x8xf32> to vector<4x8x1xf32>
    %53 = vector.broadcast %52 : vector<4x8x1xf32> to vector<4x8x8xf32>
    %54 = arith.subf %50, %53 : vector<4x8x8xf32>
    %55 = math.exp %54 : vector<4x8x8xf32>
    %cst_13 = arith.constant dense<0.000000e+00> : vector<4x8xf32>
    %56 = vector.multi_reduction <add>, %55, %cst_13 [2] : vector<4x8x8xf32> to vector<4x8xf32>
    %57 = vector.shape_cast %56 : vector<4x8xf32> to vector<4x8x1xf32>
    %58 = tpu.reciprocal %57 {approx = true} : vector<4x8x1xf32> -> vector<4x8x1xf32>
    %59 = vector.broadcast %58 : vector<4x8x1xf32> to vector<4x8x8xf32>
    %60 = arith.mulf %55, %59 : vector<4x8x8xf32>
    %61 = arith.truncf %60 : vector<4x8x8xf32> to vector<4x8x8xbf16>
    "tpu.trace_start"() <{level = 10 : i32, message = "hqk,hkd->hqd"}> : () -> ()
    %cst_14 = arith.constant dense<0.000000e+00> : vector<4x8x8xf32>
    %62 = tpu.matmul %61, %44, %cst_14 {dimension_numbers = #tpu.dot_dimension_numbers<[2], [1], [1], [2], [0, 0, 0, 1, 1, 2], [0], [0]>} : vector<4x8x8xbf16>, vector<4x8x8xbf16>, vector<4x8x8xf32> -> vector<4x8x8xf32>
    "tpu.trace_stop"() : () -> ()
    %63 = vector.extract_strided_slice %62 {offsets = [0, 0, 0], sizes = [1, 8, 8], strides = [1, 1, 1]} : vector<4x8x8xf32> to vector<1x8x8xf32>
    %64 = vector.shape_cast %63 : vector<1x8x8xf32> to vector<8x8xf32>
    %65 = vector.extract_strided_slice %62 {offsets = [1, 0, 0], sizes = [1, 8, 8], strides = [1, 1, 1]} : vector<4x8x8xf32> to vector<1x8x8xf32>
    %66 = vector.shape_cast %65 : vector<1x8x8xf32> to vector<8x8xf32>
    %67 = vector.extract_strided_slice %62 {offsets = [2, 0, 0], sizes = [1, 8, 8], strides = [1, 1, 1]} : vector<4x8x8xf32> to vector<1x8x8xf32>
    %68 = vector.shape_cast %67 : vector<1x8x8xf32> to vector<8x8xf32>
    %69 = vector.extract_strided_slice %62 {offsets = [3, 0, 0], sizes = [1, 8, 8], strides = [1, 1, 1]} : vector<4x8x8xf32> to vector<1x8x8xf32>
    %70 = vector.shape_cast %69 : vector<1x8x8xf32> to vector<8x8xf32>
    %71 = tpu.concatenate %64, %66, %68, %70 in 1 : vector<8x8xf32>, vector<8x8xf32>, vector<8x8xf32>, vector<8x8xf32> -> vector<8x32xf32>
    %72 = arith.truncf %71 : vector<8x32xf32> to vector<8x32xbf16>
    %c0_15 = arith.constant 0 : index
    %c0_16 = arith.constant 0 : index
    %c0_17 = arith.constant 0 : index
    %73 = vector.load %arg9[%c0_15, %c0_16, %c0_17] : memref<1x32x32xbf16, #tpu.memory_space<vmem>>, vector<1x32x32xbf16>
    %74 = vector.shape_cast %73 : vector<1x32x32xbf16> to vector<32x32xbf16>
    %cst_18 = arith.constant dense<0.000000e+00> : vector<8x32xf32>
    %75 = tpu.matmul %72, %74, %cst_18 {dimension_numbers = #tpu.dot_dimension_numbers<[1], [0], [0], [1], [0, 0, 1, 1], [], []>} : vector<8x32xbf16>, vector<32x32xbf16>, vector<8x32xf32> -> vector<8x32xf32>
    %c0_19 = arith.constant 0 : index
    %c0_20 = arith.constant 0 : index
    %c0_21 = arith.constant 0 : index
    %76 = vector.load %arg10[%c0_19, %c0_20, %c0_21] : memref<1x1x32xf32, #tpu.memory_space<vmem>>, vector<1x1x32xf32>
    %77 = vector.shape_cast %76 : vector<1x1x32xf32> to vector<1x32xf32>
    %78 = vector.broadcast %77 : vector<1x32xf32> to vector<8x32xf32>
    %79 = arith.addf %75, %78 : vector<8x32xf32>
    %80 = arith.addf %3, %79 : vector<8x32xf32>
    %c0_22 = arith.constant 0 : index
    %c0_23 = arith.constant 0 : index
    %c0_24 = arith.constant 0 : index
    %81 = vector.load %arg11[%c0_22, %c0_23, %c0_24] : memref<1x1x32xf32, #tpu.memory_space<vmem>>, vector<1x1x32xf32>
    %82 = vector.shape_cast %81 : vector<1x1x32xf32> to vector<1x32xf32>
    %c0_25 = arith.constant 0 : index
    %c0_26 = arith.constant 0 : index
    %c0_27 = arith.constant 0 : index
    %83 = vector.load %arg12[%c0_25, %c0_26, %c0_27] : memref<1x1x32xf32, #tpu.memory_space<vmem>>, vector<1x1x32xf32>
    %84 = vector.shape_cast %83 : vector<1x1x32xf32> to vector<1x32xf32>
    %cst_28 = arith.constant dense<0.000000e+00> : vector<8xf32>
    %85 = vector.multi_reduction <add>, %80, %cst_28 [1] : vector<8x32xf32> to vector<8xf32>
    %86 = vector.shape_cast %85 : vector<8xf32> to vector<8x1xf32>
    %cst_29 = arith.constant 3.200000e+01 : f32
    %87 = vector.broadcast %cst_29 : f32 to vector<8x1xf32>
    %88 = arith.divf %86, %87 : vector<8x1xf32>
    %89 = vector.broadcast %88 : vector<8x1xf32> to vector<8x32xf32>
    %90 = arith.subf %80, %89 : vector<8x32xf32>
    %91 = arith.mulf %90, %90 : vector<8x32xf32>
    %cst_30 = arith.constant dense<0.000000e+00> : vector<8xf32>
    %92 = vector.multi_reduction <add>, %91, %cst_30 [1] : vector<8x32xf32> to vector<8xf32>
    %93 = vector.shape_cast %92 : vector<8xf32> to vector<8x1xf32>
    %cst_31 = arith.constant 3.200000e+01 : f32
    %94 = vector.broadcast %cst_31 : f32 to vector<8x1xf32>
    %95 = arith.divf %93, %94 : vector<8x1xf32>
    %96 = vector.broadcast %88 : vector<8x1xf32> to vector<8x32xf32>
    %97 = arith.subf %80, %96 : vector<8x32xf32>
    %cst_32 = arith.constant 9.99999996E-13 : f32
    %98 = vector.broadcast %cst_32 : f32 to vector<8x1xf32>
    %99 = arith.addf %95, %98 : vector<8x1xf32>
    %100 = math.rsqrt %99 : vector<8x1xf32>
    %101 = vector.broadcast %100 : vector<8x1xf32> to vector<8x32xf32>
    %102 = arith.mulf %97, %101 : vector<8x32xf32>
    %103 = vector.broadcast %82 : vector<1x32xf32> to vector<8x32xf32>
    %104 = arith.mulf %102, %103 : vector<8x32xf32>
    %105 = vector.broadcast %84 : vector<1x32xf32> to vector<8x32xf32>
    %106 = arith.addf %104, %105 : vector<8x32xf32>
    %107 = arith.truncf %106 : vector<8x32xf32> to vector<8x32xbf16>
    %c0_33 = arith.constant 0 : index
    %c0_34 = arith.constant 0 : index
    %c0_35 = arith.constant 0 : index
    %108 = vector.load %arg13[%c0_33, %c0_34, %c0_35] : memref<1x32x64xbf16, #tpu.memory_space<vmem>>, vector<1x32x64xbf16>
    %109 = vector.shape_cast %108 : vector<1x32x64xbf16> to vector<32x64xbf16>
    %cst_36 = arith.constant dense<0.000000e+00> : vector<8x64xf32>
    %110 = tpu.matmul %107, %109, %cst_36 {dimension_numbers = #tpu.dot_dimension_numbers<[1], [0], [0], [1], [0, 0, 1, 1], [], []>} : vector<8x32xbf16>, vector<32x64xbf16>, vector<8x64xf32> -> vector<8x64xf32>
    %c0_37 = arith.constant 0 : index
    %c0_38 = arith.constant 0 : index
    %c0_39 = arith.constant 0 : index
    %111 = vector.load %arg14[%c0_37, %c0_38, %c0_39] : memref<1x1x64xf32, #tpu.memory_space<vmem>>, vector<1x1x64xf32>
    %112 = vector.shape_cast %111 : vector<1x1x64xf32> to vector<1x64xf32>
    %113 = vector.broadcast %112 : vector<1x64xf32> to vector<8x64xf32>
    %114 = arith.addf %110, %113 : vector<8x64xf32>
    %cst_40 = arith.constant 5.000000e-01 : f32
    %115 = vector.broadcast %cst_40 : f32 to vector<8x64xf32>
    %116 = arith.mulf %115, %114 : vector<8x64xf32>
    %cst_41 = arith.constant 4.471500e-02 : f32
    %117 = vector.broadcast %cst_41 : f32 to vector<8x64xf32>
    %118 = arith.mulf %117, %114 : vector<8x64xf32>
    %119 = arith.mulf %118, %114 : vector<8x64xf32>
    %120 = arith.mulf %119, %114 : vector<8x64xf32>
    %121 = arith.addf %114, %120 : vector<8x64xf32>
    %cst_42 = arith.constant 0.797884583 : f32
    %122 = vector.broadcast %cst_42 : f32 to vector<8x64xf32>
    %123 = arith.mulf %122, %121 : vector<8x64xf32>
    %124 = math.tanh %123 : vector<8x64xf32>
    %cst_43 = arith.constant 1.000000e+00 : f32
    %125 = vector.broadcast %cst_43 : f32 to vector<8x64xf32>
    %126 = arith.addf %125, %124 : vector<8x64xf32>
    %127 = arith.mulf %116, %126 : vector<8x64xf32>
    %128 = arith.truncf %127 : vector<8x64xf32> to vector<8x64xbf16>
    %c0_44 = arith.constant 0 : index
    %c0_45 = arith.constant 0 : index
    %c0_46 = arith.constant 0 : index
    %129 = vector.load %arg15[%c0_44, %c0_45, %c0_46] : memref<1x64x32xbf16, #tpu.memory_space<vmem>>, vector<1x64x32xbf16>
    %130 = vector.shape_cast %129 : vector<1x64x32xbf16> to vector<64x32xbf16>
    %cst_47 = arith.constant dense<0.000000e+00> : vector<8x32xf32>
    %131 = tpu.matmul %128, %130, %cst_47 {dimension_numbers = #tpu.dot_dimension_numbers<[1], [0], [0], [1], [0, 0, 1, 1], [], []>} : vector<8x64xbf16>, vector<64x32xbf16>, vector<8x32xf32> -> vector<8x32xf32>
    %c0_48 = arith.constant 0 : index
    %c0_49 = arith.constant 0 : index
    %c0_50 = arith.constant 0 : index
    %132 = vector.load %arg16[%c0_48, %c0_49, %c0_50] : memref<1x1x32xf32, #tpu.memory_space<vmem>>, vector<1x1x32xf32>
    %133 = vector.shape_cast %132 : vector<1x1x32xf32> to vector<1x32xf32>
    %134 = vector.broadcast %133 : vector<1x32xf32> to vector<8x32xf32>
    %135 = arith.addf %131, %134 : vector<8x32xf32>
    %136 = arith.addf %106, %135 : vector<8x32xf32>
    %c0_51 = arith.constant 0 : index
    %c0_52 = arith.constant 0 : index
    %c0_53 = arith.constant 0 : index
    %137 = vector.load %arg17[%c0_51, %c0_52, %c0_53] : memref<1x1x32xf32, #tpu.memory_space<vmem>>, vector<1x1x32xf32>
    %138 = vector.shape_cast %137 : vector<1x1x32xf32> to vector<1x32xf32>
    %c0_54 = arith.constant 0 : index
    %c0_55 = arith.constant 0 : index
    %c0_56 = arith.constant 0 : index
    %139 = vector.load %arg18[%c0_54, %c0_55, %c0_56] : memref<1x1x32xf32, #tpu.memory_space<vmem>>, vector<1x1x32xf32>
    %140 = vector.shape_cast %139 : vector<1x1x32xf32> to vector<1x32xf32>
    %cst_57 = arith.constant dense<0.000000e+00> : vector<8xf32>
    %141 = vector.multi_reduction <add>, %136, %cst_57 [1] : vector<8x32xf32> to vector<8xf32>
    %142 = vector.shape_cast %141 : vector<8xf32> to vector<8x1xf32>
    %cst_58 = arith.constant 3.200000e+01 : f32
    %143 = vector.broadcast %cst_58 : f32 to vector<8x1xf32>
    %144 = arith.divf %142, %143 : vector<8x1xf32>
    %145 = vector.broadcast %144 : vector<8x1xf32> to vector<8x32xf32>
    %146 = arith.subf %136, %145 : vector<8x32xf32>
    %147 = arith.mulf %146, %146 : vector<8x32xf32>
    %cst_59 = arith.constant dense<0.000000e+00> : vector<8xf32>
    %148 = vector.multi_reduction <add>, %147, %cst_59 [1] : vector<8x32xf32> to vector<8xf32>
    %149 = vector.shape_cast %148 : vector<8xf32> to vector<8x1xf32>
    %cst_60 = arith.constant 3.200000e+01 : f32
    %150 = vector.broadcast %cst_60 : f32 to vector<8x1xf32>
    %151 = arith.divf %149, %150 : vector<8x1xf32>
    %152 = vector.broadcast %144 : vector<8x1xf32> to vector<8x32xf32>
    %153 = arith.subf %136, %152 : vector<8x32xf32>
    %cst_61 = arith.constant 9.99999996E-13 : f32
    %154 = vector.broadcast %cst_61 : f32 to vector<8x1xf32>
    %155 = arith.addf %151, %154 : vector<8x1xf32>
    %156 = math.rsqrt %155 : vector<8x1xf32>
    %157 = vector.broadcast %156 : vector<8x1xf32> to vector<8x32xf32>
    %158 = arith.mulf %153, %157 : vector<8x32xf32>
    %159 = vector.broadcast %138 : vector<1x32xf32> to vector<8x32xf32>
    %160 = arith.mulf %158, %159 : vector<8x32xf32>
    %161 = vector.broadcast %140 : vector<1x32xf32> to vector<8x32xf32>
    %162 = arith.addf %160, %161 : vector<8x32xf32>
    %c0_62 = arith.constant 0 : index
    %c0_63 = arith.constant 0 : index
    %163 = vector.load %arg23[%c0_62, %c0_63] : memref<8x32xf32, #tpu.memory_space<vmem>>, vector<8x32xf32>
    tpu.vector_store %arg23[%c0_62, %c0_63], %162 {strides = array<i32>} : memref<8x32xf32, #tpu.memory_space<vmem>>, vector<8x32xf32>,
    %c1_i32 = arith.constant 1 : i32
    %164 = arith.cmpi eq, %arg1, %c1_i32 : i32
    %165 = arith.extui %164 : i1 to i32
    %c0_i32_64 = arith.constant 0 : i32
    %166 = arith.cmpi ne, %165, %c0_i32_64 : i32
    scf.if %166 {
      %167 = arith.truncf %162 : vector<8x32xf32> to vector<8x32xbf16>
      %c0_65 = arith.constant 0 : index
      %c0_66 = arith.constant 0 : index
      %168 = vector.load %arg19[%c0_65, %c0_66] : memref<32x128xbf16, #tpu.memory_space<vmem>>, vector<32x128xbf16>
      %cst_67 = arith.constant dense<0.000000e+00> : vector<8x128xf32>
      %169 = tpu.matmul %167, %168, %cst_67 {dimension_numbers = #tpu.dot_dimension_numbers<[1], [0], [0], [1], [0, 0, 1, 1], [], []>} : vector<8x32xbf16>, vector<32x128xbf16>, vector<8x128xf32> -> vector<8x128xf32>
      %c0_68 = arith.constant 0 : index
      %c0_69 = arith.constant 0 : index
      %170 = vector.load %arg20[%c0_68, %c0_69] : memref<1x128xf32, #tpu.memory_space<vmem>>, vector<1x128xf32>
      %171 = vector.broadcast %170 : vector<1x128xf32> to vector<8x128xf32>
      %172 = arith.addf %169, %171 : vector<8x128xf32>
      %c0_70 = arith.constant 0 : index
      %c0_71 = arith.constant 0 : index
      %c0_72 = arith.constant 0 : index
      %173 = vector.load %arg21[%c0_70, %c0_71, %c0_72] : memref<1x8x128xf32, #tpu.memory_space<vmem>>, vector<1x8x128xf32>
      %174 = vector.shape_cast %173 : vector<1x8x128xf32> to vector<8x128xf32>
      %175 = vector.shape_cast %172 : vector<8x128xf32> to vector<1x8x128xf32>
      tpu.vector_store %arg21[%c0_70, %c0_71, %c0_72], %175 {strides = array<i32>} : memref<1x8x128xf32, #tpu.memory_space<vmem>>, vector<1x8x128xf32>,
      %c0_73 = arith.constant 0 : index
      %c0_74 = arith.constant 0 : index
      %c0_75 = arith.constant 0 : index
      %176 = vector.load %arg4[%c0_73, %c0_74, %c0_75] : memref<1x8x1xi32, #tpu.memory_space<vmem>>, vector<1x8x1xi32>
      %177 = vector.shape_cast %176 : vector<1x8x1xi32> to vector<8x1xi32>
      %178 = tpu.iota {dimensions = array<i32: 1>} : vector<8x128xi32>
      %179 = vector.broadcast %177 : vector<8x1xi32> to vector<8x128xi32>
      %180 = arith.cmpi eq, %178, %179 : vector<8x128xi32>
      %181 = arith.extui %180 : vector<8x128xi1> to vector<8x128xi32>
      %182 = arith.sitofp %181 : vector<8x128xi32> to vector<8x128xf32>
      %cst_76 = arith.constant dense<0xFF800000> : vector<8xf32>
      %183 = vector.multi_reduction <maximumf>, %172, %cst_76 [1] : vector<8x128xf32> to vector<8xf32>
      %184 = vector.shape_cast %183 : vector<8xf32> to vector<8x1xf32>
      %185 = vector.broadcast %184 : vector<8x1xf32> to vector<8x128xf32>
      %186 = arith.subf %172, %185 : vector<8x128xf32>
      %187 = math.exp %186 : vector<8x128xf32>
      %cst_77 = arith.constant dense<0.000000e+00> : vector<8xf32>
      %188 = vector.multi_reduction <add>, %187, %cst_77 [1] : vector<8x128xf32> to vector<8xf32>
      %189 = vector.shape_cast %188 : vector<8xf32> to vector<8x1xf32>
      %190 = math.log %189 : vector<8x1xf32>
      %191 = arith.addf %190, %184 : vector<8x1xf32>
      %192 = vector.broadcast %191 : vector<8x1xf32> to vector<8x128xf32>
      %193 = arith.subf %172, %192 : vector<8x128xf32>
      %194 = arith.mulf %182, %193 : vector<8x128xf32>
      %cst_78 = arith.constant dense<0.000000e+00> : vector<8xf32>
      %195 = vector.multi_reduction <add>, %194, %cst_78 [1] : vector<8x128xf32> to vector<8xf32>
      %196 = vector.shape_cast %195 : vector<8xf32> to vector<8x1xf32>
      %c-100_i32 = arith.constant -100 : i32
      %197 = vector.broadcast %c-100_i32 : i32 to vector<8x1xi32>
      %198 = arith.cmpi ne, %177, %197 : vector<8x1xi32>
      %199 = arith.extui %198 : vector<8x1xi1> to vector<8x1xi32>
      %200 = arith.sitofp %199 : vector<8x1xi32> to vector<8x1xf32>
      %201 = arith.mulf %196, %200 : vector<8x1xf32>
      %202 = vector.shape_cast %201 : vector<8x1xf32> to vector<1x8x1xf32>
      %cst_79 = arith.constant dense<0.000000e+00> : vector<1xf32>
      %203 = vector.multi_reduction <add>, %202, %cst_79 [1, 2] : vector<1x8x1xf32> to vector<1xf32>
      %204 = vector.shape_cast %203 : vector<1xf32> to vector<1x1x1xf32>
      %205 = vector.extract %204[0, 0, 0] : f32 from vector<1x1x1xf32>
      %206 = vector.shape_cast %200 : vector<8x1xf32> to vector<1x8x1xf32>
      %cst_80 = arith.constant dense<0.000000e+00> : vector<1xf32>
      %207 = vector.multi_reduction <add>, %206, %cst_80 [1, 2] : vector<1x8x1xf32> to vector<1xf32>
      %208 = vector.shape_cast %207 : vector<1xf32> to vector<1x1x1xf32>
      %209 = vector.extract %208[0, 0, 0] : f32 from vector<1x1x1xf32>
      %210 = tpu.iota {dimensions = array<i32: 1>} : vector<1x128xi32>
      %c0_i32_81 = arith.constant 0 : i32
      %211 = vector.broadcast %c0_i32_81 : i32 to vector<1x128xi32>
      %212 = arith.cmpi eq, %210, %211 : vector<1x128xi32>
      %c1_i32_82 = arith.constant 1 : i32
      %213 = vector.broadcast %c1_i32_82 : i32 to vector<1x128xi32>
      %214 = arith.cmpi eq, %210, %213 : vector<1x128xi32>
      %cst_83 = arith.constant 0.000000e+00 : f32
      %215 = vector.broadcast %209 : f32 to vector<1x128xf32>
      %216 = vector.broadcast %cst_83 : f32 to vector<1x128xf32>
      %217 = arith.select %214, %215, %216 : vector<1x128xi1>, vector<1x128xf32>
      %218 = vector.broadcast %205 : f32 to vector<1x128xf32>
      %219 = arith.select %212, %218, %217 : vector<1x128xi1>, vector<1x128xf32>
      %c0_84 = arith.constant 0 : index
      %c0_85 = arith.constant 0 : index
      %c0_86 = arith.constant 0 : index
      %220 = vector.load %arg22[%c0_84, %c0_85, %c0_86] : memref<1x1x128xf32, #tpu.memory_space<vmem>>, vector<1x1x128xf32>
      %221 = vector.shape_cast %220 : vector<1x1x128xf32> to vector<1x128xf32>
      %222 = vector.shape_cast %219 : vector<1x128xf32> to vector<1x1x128xf32>
      tpu.vector_store %arg22[%c0_84, %c0_85, %c0_86], %222 {strides = array<i32>} : memref<1x1x128xf32, #tpu.memory_space<vmem>>, vector<1x1x128xf32>,
    } else {
    }
    return
  }
  func.func @transform_0(%arg0: i32, %arg1: i32) -> (i32, i32, i32) {
    %c0_i32 = arith.constant 0 : i32
    %c0_i32_0 = arith.constant 0 : i32
    %c0_i32_1 = arith.constant 0 : i32
    return %arg0, %c0_i32, %c0_i32_0 : i32, i32, i32
  }
  func.func @transform_1(%arg0: i32, %arg1: i32) -> (i32, i32, i32) {
    %c0_i32 = arith.constant 0 : i32
    %c0_i32_0 = arith.constant 0 : i32
    %c0_i32_1 = arith.constant 0 : i32
    return %arg0, %c0_i32, %c0_i32_0 : i32, i32, i32
  }
  func.func @transform_2(%arg0: i32, %arg1: i32) -> (i32, i32, i32) {
    %c0_i32 = arith.constant 0 : i32
    %c0_i32_0 = arith.constant 0 : i32
    %c0_i32_1 = arith.constant 0 : i32
    return %arg0, %c0_i32, %c0_i32_0 : i32, i32, i32
  }
  func.func @transform_3(%arg0: i32, %arg1: i32) -> (i32, i32) {
    %c0_i32 = arith.constant 0 : i32
    %c0_i32_0 = arith.constant 0 : i32
    %c0_i32_1 = arith.constant 0 : i32
    return %c0_i32, %c0_i32_0 : i32, i32
  }
  func.func @transform_4(%arg0: i32, %arg1: i32) -> (i32, i32) {
    %c0_i32 = arith.constant 0 : i32
    %c0_i32_0 = arith.constant 0 : i32
    %c0_i32_1 = arith.constant 0 : i32
    return %c0_i32, %c0_i32_0 : i32, i32
  }
  func.func @transform_5(%arg0: i32, %arg1: i32) -> (i32, i32, i32) {
    %c0_i32 = arith.constant 0 : i32
    %c0_i32_0 = arith.constant 0 : i32
    %c0_i32_1 = arith.constant 0 : i32
    return %arg1, %c0_i32, %c0_i32_0 : i32, i32, i32
  }
  func.func @transform_6(%arg0: i32, %arg1: i32) -> (i32, i32, i32) {
    %c0_i32 = arith.constant 0 : i32
    %c0_i32_0 = arith.constant 0 : i32
    %c0_i32_1 = arith.constant 0 : i32
    return %arg1, %c0_i32, %c0_i32_0 : i32, i32, i32
  }
  func.func @transform_7(%arg0: i32, %arg1: i32) -> (i32, i32, i32) {
    %c0_i32 = arith.constant 0 : i32
    %c0_i32_0 = arith.constant 0 : i32
    %c0_i32_1 = arith.constant 0 : i32
    return %arg1, %c0_i32, %c0_i32_0 : i32, i32, i32
  }
  func.func @transform_8(%arg0: i32, %arg1: i32) -> (i32, i32, i32) {
    %c0_i32 = arith.constant 0 : i32
    %c0_i32_0 = arith.constant 0 : i32
    %c0_i32_1 = arith.constant 0 : i32
    return %arg1, %c0_i32, %c0_i32_0 : i32, i32, i32
  }
  func.func @transform_9(%arg0: i32, %arg1: i32) -> (i32, i32, i32) {
    %c0_i32 = arith.constant 0 : i32
    %c0_i32_0 = arith.constant 0 : i32
    %c0_i32_1 = arith.constant 0 : i32
    return %arg1, %c0_i32, %c0_i32_0 : i32, i32, i32
  }
  func.func @transform_10(%arg0: i32, %arg1: i32) -> (i32, i32, i32) {
    %c0_i32 = arith.constant 0 : i32
    %c0_i32_0 = arith.constant 0 : i32
    %c0_i32_1 = arith.constant 0 : i32
    return %arg1, %c0_i32, %c0_i32_0 : i32, i32, i32
  }
  func.func @transform_11(%arg0: i32, %arg1: i32) -> (i32, i32, i32) {
    %c0_i32 = arith.constant 0 : i32
    %c0_i32_0 = arith.constant 0 : i32
    %c0_i32_1 = arith.constant 0 : i32
    return %arg1, %c0_i32, %c0_i32_0 : i32, i32, i32
  }
  func.func @transform_12(%arg0: i32, %arg1: i32) -> (i32, i32, i32) {
    %c0_i32 = arith.constant 0 : i32
    %c0_i32_0 = arith.constant 0 : i32
    %c0_i32_1 = arith.constant 0 : i32
    return %arg1, %c0_i32, %c0_i32_0 : i32, i32, i32
  }
  func.func @transform_13(%arg0: i32, %arg1: i32) -> (i32, i32, i32) {
    %c0_i32 = arith.constant 0 : i32
    %c0_i32_0 = arith.constant 0 : i32
    %c0_i32_1 = arith.constant 0 : i32
    return %arg1, %c0_i32, %c0_i32_0 : i32, i32, i32
  }
  func.func @transform_14(%arg0: i32, %arg1: i32) -> (i32, i32, i32) {
    %c0_i32 = arith.constant 0 : i32
    %c0_i32_0 = arith.constant 0 : i32
    %c0_i32_1 = arith.constant 0 : i32
    return %arg1, %c0_i32, %c0_i32_0 : i32, i32, i32
  }
  func.func @transform_15(%arg0: i32, %arg1: i32) -> (i32, i32, i32) {
    %c0_i32 = arith.constant 0 : i32
    %c0_i32_0 = arith.constant 0 : i32
    %c0_i32_1 = arith.constant 0 : i32
    return %arg1, %c0_i32, %c0_i32_0 : i32, i32, i32
  }
  func.func @transform_16(%arg0: i32, %arg1: i32) -> (i32, i32, i32) {
    %c0_i32 = arith.constant 0 : i32
    %c0_i32_0 = arith.constant 0 : i32
    %c0_i32_1 = arith.constant 0 : i32
    return %arg1, %c0_i32, %c0_i32_0 : i32, i32, i32
  }
  func.func @transform_17(%arg0: i32, %arg1: i32) -> (i32, i32) {
    %c0_i32 = arith.constant 0 : i32
    %c0_i32_0 = arith.constant 0 : i32
    %c0_i32_1 = arith.constant 0 : i32
    return %c0_i32, %c0_i32_0 : i32, i32
  }
  func.func @transform_18(%arg0: i32, %arg1: i32) -> (i32, i32) {
    %c0_i32 = arith.constant 0 : i32
    %c0_i32_0 = arith.constant 0 : i32
    %c0_i32_1 = arith.constant 0 : i32
    return %c0_i32, %c0_i32_0 : i32, i32
  }
  func.func @transform_19(%arg0: i32, %arg1: i32) -> (i32, i32, i32) {
    %c0_i32 = arith.constant 0 : i32
    %c0_i32_0 = arith.constant 0 : i32
    %c0_i32_1 = arith.constant 0 : i32
    return %arg0, %c0_i32, %c0_i32_0 : i32, i32, i32
  }
  func.func @transform_20(%arg0: i32, %arg1: i32) -> (i32, i32, i32) {
    %c0_i32 = arith.constant 0 : i32
    %c0_i32_0 = arith.constant 0 : i32
    %c0_i32_1 = arith.constant 0 : i32
    return %arg0, %c0_i32, %c0_i32_0 : i32, i32, i32
  }
}

</mosaic_0001>

<bundles_post_ra>
// kernel: tpu_custom_call.1
= control target key start
LH: loop header
LB: loop body
LE: loop exit
PB: predicated region body
PF: predicated region fallthrough
CT: control target
= control target key end

     0   :  { %s3431_s0 = inlined_call_operand.vmem [shape: f32[2,8,32], index: 0, kind: input, shape index: {}]   ;;  %s3432_s1 = inlined_call_operand.hbm [shape: f32[2,1,8], index: 1, kind: input, shape index: {}]   ;;  %s3433_s2 = inlined_call_operand.vmem [shape: s32[2,8,1], index: 2, kind: input, shape index: {}]   ;;  %s3434_s3 = inlined_call_operand.vmem [shape: f32[1,32], index: 3, kind: input, shape index: {}]   ;;  %s3435_s4 = inlined_call_operand.hbm [shape: f32[1,32], index: 4, kind: input, shape index: {}]   ;;  %s3436_s5 = inlined_call_operand.vmem [shape: bf16[2,32,96], index: 5, kind: input, shape index: {}]   ;;  %s3437_s6 = inlined_call_operand.hbm [shape: f32[2,1,96], index: 6, kind: input, shape index: {}]   ;;  %s3438_s7 = inlined_call_operand.vmem [shape: bf16[2,32,32], index: 7, kind: input, shape index: {}]   ;;  %s3439_s8 = inlined_call_operand.hbm [shape: f32[2,1,32], index: 8, kind: input, shape index: {}]   ;;  %s3440_s9 = inlined_call_operand.hbm [shape: f32[2,1,32], index: 9, kind: input, shape index: {}]   ;;  %s3441_s10 = inlined_call_operand.hbm [shape: f32[2,1,32], index: 10, kind: input, shape index: {}]   ;;  %s3442_s11 = inlined_call_operand.vmem [shape: bf16[2,32,64], index: 11, kind: input, shape index: {}]   ;;  %s3443_s12 = inlined_call_operand.hbm [shape: f32[2,1,64], index: 12, kind: input, shape index: {}]   ;;  %s3444_s13 = inlined_call_operand.vmem [shape: bf16[2,64,32], index: 13, kind: input, shape index: {}]   ;;  %s3445_s14 = inlined_call_operand.hbm [shape: f32[2,1,32], index: 14, kind: input, shape index: {}]   ;;  %s3446_s15 = inlined_call_operand.hbm [shape: f32[2,1,32], index: 15, kind: input, shape index: {}]   ;;  %s3447_s16 = inlined_call_operand.hbm [shape: f32[2,1,32], index: 16, kind: input, shape index: {}]   ;;  %s3448_s17 = inlined_call_operand.vmem [shape: bf16[32,128], index: 17, kind: input, shape index: {}]   ;;  %s3449_s18 = inlined_call_operand.vmem [shape: f32[1,128], index: 18, kind: input, shape index: {}]   ;;  %s3450_s19 = inlined_call_operand.hbm [shape: f32[2,8,128], index: 19, kind: output, shape index: {0}]   ;;  %s3451_s20 = inlined_call_operand.hbm [shape: f32[2,1,128], index: 20, kind: output, shape index: {1}]  }
   0x1   :  { %3467 = sst [smem:[#allocation37_spill]] %s3431_s0 }
   0x2   :  { %3468 = sst [smem:[#allocation38_spill]] %s3432_s1 }
   0x3   :  { %3469 = sst [smem:[#allocation39_spill]] %s3433_s2 }
   0x4   :  { %3470 = sst [smem:[#allocation40_spill]] %s3434_s3 }
   0x5   :  { %3471 = sst [smem:[#allocation41_spill]] %s3435_s4 }
   0x6   :  { %3472 = sst [smem:[#allocation42_spill]] %s3436_s5 }
   0x7   :  { %3473 = sst [smem:[#allocation43_spill]] %s3437_s6 }
   0x8   :  { %3474 = sst [smem:[#allocation44_spill]] %s3438_s7 }
   0x9   :  { %3475 = sst [smem:[#allocation45_spill]] %s3439_s8 }
   0xa   :  { %3476 = sst [smem:[#allocation46_spill]] %s3440_s9 }
   0xb   :  { %3477 = sst [smem:[#allocation47_spill]] %s3441_s10 }
   0xc   :  { %3478 = sst [smem:[#allocation48_spill]] %s3442_s11 }
   0xd   :  { %3479 = sst [smem:[#allocation49_spill]] %s3443_s12 }
   0xe   :  { %3480 = sst [smem:[#allocation50_spill]] %s3444_s13 }
   0xf   :  { %3481 = sst [smem:[#allocation51_spill]] %s3445_s14 }
  0x10   :  { %3482 = sst [smem:[#allocation52_spill]] %s3446_s15 }
  0x11   :  { %3483 = sst [smem:[#allocation53_spill]] %s3447_s16 }
  0x12   :  { %3484 = sst [smem:[#allocation54_spill]] %s3448_s17 }
  0x13   :  { %3485 = sst [smem:[#allocation55_spill]] %s3449_s18 }
  0x14   :  { %3486 = sst [smem:[#allocation56_spill]] %s3450_s19 }
  0x15   :  { %3487 = sst [smem:[#allocation57_spill]] %s3451_s20 }
  0x16   :  { %26 = vsyncpa [#allocation4], 0 }
  0x17   :  { %28 = vsyncpa [#allocation4 + $0x1], 0 }
  0x18   :  { %29 = vsyncpa [#allocation7], 0 }
  0x19   :  { %30 = vsyncpa [#allocation5], 0 }
  0x1a   :  { %32 = vsyncpa [#allocation5 + $0x1], 0 }
  0x1b   :  { %33 = vsyncpa [#allocation18], 0 }
  0x1c   :  { %35 = vsyncpa [#allocation18 + $0x1], 0  ;;  %s2962_s1 = smov 0   ;;  %s2964_s22 = smov 0  }
  0x1d   :  { %s2966_s23 = smov 0   ;;  %s2968_s24 = smov 0  }
  0x1e   :  { %s2970_s2 = smov 0   ;;  %s2972_s25 = smov 0  }
  0x1f   :  { %s2974_s3 = smov 0   ;;  %s2976_s26 = smov 0  }
  0x20   :  { %s2978_s27 = smov 0   ;;  %s2980_s28 = smov 0  }
  0x21   :  { %s2982_s4 = smov 0  }
  0x22 LB: > { %3488 = sst [smem:[#allocation24_spill]] %s2806_s22  ;;  %s2058_s29 = sadd.s32 4294967294, %s2842_s4   ;;  %s2842_s4 = sphi %s2982_s4, %s41_s4   ;;  %s2838_s28 = sphi %s2980_s28, %s3547_s28   ;;  %s2834_s27 = sphi %s2978_s27, %s3546_s27   ;;  %s2830_s26 = sphi %s2976_s26, %s3545_s26   ;;  %s2826_s3 = sphi %s2974_s3, %s3544_s3   ;;  %s2822_s25 = sphi %s2972_s25, %s3543_s25   ;;  %s2818_s2 = sphi %s2970_s2, %s3542_s2   ;;  %s2814_s24 = sphi %s2968_s24, %s3541_s24   ;;  %s2810_s23 = sphi %s2966_s23, %s3540_s23   ;;  %s2806_s22 = sphi %s2964_s22, %s3539_s22   ;;  %s2802_s1 = sphi %s2962_s1, %s3538_s1  }
  0x23   : > { %3489 = sst [smem:[#allocation25_spill]] %s2810_s23  ;;  %s50_s30 = sadd.s32 1, %s2834_s27 }
  0x24   : > { %3490 = sst [smem:[#allocation26_spill]] %s2818_s2  ;;  %p51_p0 = scmp.ge.s32.totalorder %s50_s30, 2 }
  0x25   : > { %3491 = sst [smem:[#allocation27_spill]] %s2822_s25  ;;  %s53_s0 = sadd.s32 1, %s2838_s28 }
  0x26   : > { %3492 = sst [smem:[#allocation28_spill]] %s2826_s3  ;;  %s86_s21 = sadd.s32 1, %s2822_s25 }
  0x27   : > { %3493 = sst [smem:[#allocation29_spill]] %s2830_s26  ;;  %p93_p1 = scmp.ne.s32.totalorder %s2822_s25, %s2818_s2 }
  0x28   : > { %3494 = sst [smem:[#allocation30_spill]] %s2834_s27  ;;  %s3549_s30 = smov (%p51_p0, %s50_s30), 0 }
  0x29   : > { %3495 = sst [smem:[#allocation31_spill]] %s2838_s28  ;;  %s3551_s0 = smov (!%p51_p0, %s53_s0), %s2838_s28 }
  0x2a   : > { %3496 = sst [smem:[#allocation32_spill]] %s3549_s30  ;;  %p94_p2 = scmp.eq.s32.totalorder %s2842_s4, 0 }
  0x2b   : > { %p99_p3 = scmp.ne.s32.totalorder %s2818_s2, %s2814_s24  ;;  %p55_p4 = scmp.ge.s32.totalorder %s3551_s0, 2 }
  0x2c   : > { %s203_s20 = ssub.s32 %s2834_s27, %s3549_s30  ;;  %p3034_p5 = por %p94_p2, %p93_p1 }
  0x2d   : > { %p204_p6 = scmp.eq.s32.totalorder %s203_s20, 0  ;;  %s3553_s0 = smov (%p55_p4, %s3551_s0), 0 }
  0x2e   : > { %3498 = sst [smem:[#allocation33_spill]] %s3553_s0  ;;  %s206_s18 = sadd.s32 1, %s2810_s23 }
  0x2f   : > { %p213_p7 = scmp.ne.s32.totalorder %s2810_s23, %s2806_s22  ;;  %s83_s17 = ssub.s32 %s2838_s28, %s3553_s0 }
  0x30   : > { %p551_p8 = scmp.eq.s32.totalorder %s2058_s29, 3  ;;  %p84_p9 = scmp.eq.s32.totalorder %s83_s17, 0 }
  0x31   : > { %p3045_p10 = por %p213_p7, %p94_p2  ;;  %p2230_p12 = scmp.lt.s32.totalorder %s2842_s4, 4 }
  0x32   : > { %s3050_s30 = scalar_select %p204_p6, %s2810_s23, %s206_s18  }
  0x33   : > { %s3053_s11 = scalar_select %p84_p9, %s2822_s25, %s86_s21  }
  0x34   : > { %3500 = sst [smem:[#allocation34_spill]] %s3050_s30  ;;  %p3058_p11 = por %p551_p8, %p99_p3 }
  0x35   : > { %3501 = sst [smem:[#allocation35_spill]] %s3053_s11  ;;  %s625_s0 = sand.u32 1, %s2842_s4  }
  0x36   : > { %s3502_s20 = scalar_select %p3058_p11, 1, 0 }
  0x37   : > { %s627_s29 = sand.u32 1, %s2822_s25   ;;  %s3504_s5 = sld [smem:[#allocation38_spill]] }
  0x38   : > { %3503 = sst [smem:[#allocation36_spill]] %s3502_s20  ;;  %s628_s16 = scalar_lea.vmem [#allocation3], %s627_s29 }
  0x39   : > { %s635_s15 = sshll.u32 %s628_s16, 4  ;;  %p2195_p13 = pnand %p2230_p12, %p3034_p5  ;;  %s636_s15 = int_to_ptr.vmem [resolvable:$true] %s635_s15 }
  0x3a   : > { %p3073_p0 = pnand %p2230_p12, %p3045_p10  ;;  %s3078_s21 = sand.u32 1, %s2810_s23  }
  0x3b   : > { %s3506_s6 = sld [smem:[#allocation43_spill]]  ;;  %s3084_s7 = scalar_lea.sflag [#allocation4], %s625_s0 }
  0x3c   : > { %s660_s16 = scalar_lea.vmem [#allocation8], %s3078_s21  ;;  %s3507_s8 = sld [smem:[#allocation45_spill]] }
  0x3d   : > { %s631_s3 = scalar_lea.hbm %s3504_s5, %s2838_s28  ;;  %s667_s19 = sshll.u32 %s660_s16, 4  ;;  %s668_s19 = int_to_ptr.vmem [resolvable:$true] %s667_s19 }
  0x3e   : > { %s633_s26 = sshll.u32 %s631_s3, 4  ;;  %s685_s0 = scalar_lea.vmem [#allocation9], %s3078_s21  ;;  %s634_s26 = int_to_ptr.hbm [resolvable:$true] %s633_s26 }
  0x3f   : > { %2197 = dma.hbm_to_vmem [thread:$0]  (!%p2195_p13), %s634_s26, 16, %s636_s15, %s3084_s7  }
  0x40   : > { %s692_s29 = sshll.u32 %s685_s0, 4  ;;  %s3508_s9 = sld [smem:[#allocation46_spill]]  ;;  %s693_s29 = int_to_ptr.vmem [resolvable:$true] %s692_s29 }
  0x41   : > { %s663_s5 = scalar_lea.hbm %s3506_s6, %s2834_s27  ;;  %s3509_s10 = sld [smem:[#allocation47_spill]] }
  0x42   : > { %s665_s13 = sshll.u32 %s663_s5, 4  ;;  %s688_s30 = scalar_lea.hbm %s3507_s8, %s2834_s27  ;;  %s666_s13 = int_to_ptr.hbm [resolvable:$true] %s665_s13 }
  0x43   : > { %2200 = dma.hbm_to_vmem [thread:$0]  (!%p3073_p0), %s666_s13, 16, %s668_s19, %s3084_s7  }
  0x44   : > { %s690_s17 = sshll.u32 %s688_s30, 4  ;;  %s702_s13 = scalar_lea.vmem [#allocation10], %s3078_s21  ;;  %s691_s17 = int_to_ptr.hbm [resolvable:$true] %s690_s17 }
  0x45   : > { %2203 = dma.hbm_to_vmem [thread:$0]  (!%p3073_p0), %s691_s17, 16, %s693_s29, %s3084_s7  }
  0x46   : > { %s705_s5 = scalar_lea.hbm %s3508_s9, %s2834_s27  ;;  %s709_s16 = sshll.u32 %s702_s13, 4  ;;  %s710_s16 = int_to_ptr.vmem [resolvable:$true] %s709_s16 }
  0x47   : > { %s707_s19 = sshll.u32 %s705_s5, 4  ;;  %s722_s30 = scalar_lea.hbm %s3509_s10, %s2834_s27  ;;  %s708_s19 = int_to_ptr.hbm [resolvable:$true] %s707_s19 }
  0x48   : > { %2206 = dma.hbm_to_vmem [thread:$0]  (!%p3073_p0), %s708_s19, 16, %s710_s16, %s3084_s7  }
  0x49   : > { %s719_s0 = scalar_lea.vmem [#allocation11], %s3078_s21  ;;  %s724_s17 = sshll.u32 %s722_s30, 4  ;;  %s725_s17 = int_to_ptr.hbm [resolvable:$true] %s724_s17 }
  0x4a   : > { %s726_s29 = sshll.u32 %s719_s0, 4  ;;  %s3510_s12 = sld [smem:[#allocation49_spill]]  ;;  %s727_s29 = int_to_ptr.vmem [resolvable:$true] %s726_s29 }
  0x4b   : > { %2209 = dma.hbm_to_vmem [thread:$0]  (!%p3073_p0), %s725_s17, 16, %s727_s29, %s3084_s7  }
  0x4c   : > { %s744_s13 = scalar_lea.vmem [#allocation12], %s3078_s21  ;;  %s3511_s14 = sld [smem:[#allocation51_spill]] }
  0x4d   : > { %s751_s16 = sshll.u32 %s744_s13, 4  ;;  %s769_s0 = scalar_lea.vmem [#allocation13], %s3078_s21  ;;  %s752_s16 = int_to_ptr.vmem [resolvable:$true] %s751_s16 }
  0x4e   : > { %s776_s29 = sshll.u32 %s769_s0, 4  ;;  %s3140_s3 = sadd.s32 4294967295, %s2842_s4   ;;  %s777_s29 = int_to_ptr.vmem [resolvable:$true] %s776_s29 }
  0x4f   : > { %p100_p2 = scmp.eq.s32.totalorder %s3140_s3, 0  ;;  %p219_p4 = scmp.ne.s32.totalorder %s2806_s22, %s2802_s1 }
  0x50   : > { %s747_s5 = scalar_lea.hbm %s3510_s12, %s2834_s27  ;;  %p545_p5 = scmp.eq.s32.totalorder %s3140_s3, 3 }
  0x51   : > { %s749_s19 = sshll.u32 %s747_s5, 4  ;;  %s3512_s5 = sld [smem:[#allocation52_spill]]  ;;  %s750_s19 = int_to_ptr.hbm [resolvable:$true] %s749_s19 }
  0x52   : > { %2212 = dma.hbm_to_vmem [thread:$0]  (!%p3073_p0), %s750_s19, 16, %s752_s16, %s3084_s7  }
  0x53   : > { %s772_s30 = scalar_lea.hbm %s3511_s14, %s2834_s27  ;;  %s786_s16 = scalar_lea.vmem [#allocation14], %s3078_s21 }
  0x54   : > { %s774_s17 = sshll.u32 %s772_s30, 4  ;;  %s793_s19 = sshll.u32 %s786_s16, 4  ;;  %s775_s17 = int_to_ptr.hbm [resolvable:$true] %s774_s17  ;;  %s794_s19 = int_to_ptr.vmem [resolvable:$true] %s793_s19 }
  0x55   : > { %2215 = dma.hbm_to_vmem [thread:$0]  (!%p3073_p0), %s775_s17, 16, %s777_s29, %s3084_s7  }
  0x56   : > { %p2059_p6 = scmp.ge.s32.totalorder %s2842_s4, 1  ;;  %p3152_p7 = por %p100_p2, %p99_p3 }
  0x57   : > { %s789_s13 = scalar_lea.hbm %s3512_s5, %s2834_s27  ;;  %p3158_p8 = por %p219_p4, %p100_p2 }
  0x58   : > { %s791_s11 = sshll.u32 %s789_s13, 4  ;;  %p3165_p9 = por %p545_p5, %p93_p1  ;;  %s792_s11 = int_to_ptr.hbm [resolvable:$true] %s791_s11 }
  0x59   : > { %2218 = dma.hbm_to_vmem [thread:$0]  (!%p3073_p0), %s792_s11, 16, %s794_s19, %s3084_s7  }
  0x5a   : > { %p584_p10 = scmp.lt.s32.totalorder %s2842_s4, 5  ;;  %s3516_s15 = sld [smem:[#allocation41_spill]] }
  0x5b   : > { %s2844_s13 = smov [#allocation6]   ;;  %s3518_s6 = sld [smem:[#allocation53_spill]] }
  0x5c   : > { %p3173_p3 = pnand %p2059_p6, %p584_p10  ;;  %s601_s16 = sshll.u32 %s2844_s13, 4  ;;  %s602_s16 = int_to_ptr.vmem [resolvable:$true] %s601_s16 }
  0x5d   : > { %s803_s17 = scalar_lea.vmem [#allocation15], %s3078_s21  ;;  %s821_s13 = sand.u32 (!%p3173_p3), 1, %s3140_s3  }
  0x5e   : > { %p2190_p12 = pneg %p3173_p3  ;;  %s3193_s9 = sand.u32 (!%p3173_p3), 1, %s2818_s2  }
  0x60   : > { %s599_s26 = sshll.u32 %s3516_s15, 4  ;;  %p2191_p1 = pnand %p2190_p12, %p100_p2  ;;  %s600_s26 = int_to_ptr.hbm [resolvable:$true] %s599_s26 }
  0x61   : > { %s806_s8 = scalar_lea.hbm %s3518_s6, %s2834_s27  ;;  %s810_s15 = sshll.u32 %s803_s17, 4  ;;  %s811_s15 = int_to_ptr.vmem [resolvable:$true] %s810_s15 }
  0x62   : > { %s808_s1 = sshll.u32 %s806_s8, 4  ;;  %819 = sbr.rel (%p3173_p3) target bundleno = 3126 (0xc36), region = 96  ;;  %s809_s1 = int_to_ptr.hbm [resolvable:$true] %s808_s1 }
  0x63   : > { %2193 = dma.hbm_to_vmem [thread:$0]  (!%p2191_p1), %s600_s26, 16, %s602_s16, [#allocation7]  }
  0x64   : > { %2221 = dma.hbm_to_vmem [thread:$0]  (!%p3073_p0), %s809_s1, 16, %s811_s15, %s3084_s7  }
  0x65   : > { %s822_s6 = scalar_lea.sflag (!%p3173_p3), [#allocation4], %s821_s13 }
  0x67   : > { %2781 = dma.done.wait (%p3152_p7), %s822_s6, 16  }
  0x68   : > { %2783 = vsyncadd (%p3152_p7), %s822_s6, 4294967280 }
  0x69   : > { %2785 = dma.done.wait (%p100_p2), [#allocation7], 16  }
  0x6a   : > { %2787 = vsyncadd (%p100_p2), [#allocation7], 4294967280  ;;  %s3205_s8 = sand.u32 1, %s2806_s22  }
  0x6b   : > { %2789 = dma.done.wait (%p3158_p8), %s822_s6, 128  }
  0x6c   : > { %2791 = vsyncadd (%p3158_p8), %s822_s6, 4294967168  ;;  %s3519_s21 = sld [smem:[#allocation29_spill]]  ;;  %s2064_s3 = sshll.u32 %s3193_s9, 3 }
  0x6d   : > { %s3520_s7 = sld [smem:[#allocation28_spill]]  ;;  %s856_s23 = scalar_lea.vmem [#allocation10], %s3205_s8 }
  0x6e   : > { %s3521_s16 = sld [smem:[#allocation37_spill]]  ;;  %s865_s10 = scalar_lea.vmem [#allocation11], %s3205_s8 }
  0x6f   : > { %s3522_s15 = sld [smem:[#allocation39_spill]]  ;;  %s883_s18 = scalar_lea.vmem [#allocation13], %s3205_s8 }
  0x70   : > { %s3523_s12 = sld [smem:[#allocation42_spill]]  ;;  %s892_s22 = scalar_lea.vmem [#allocation14], %s3205_s8 }
  0x71   : > { %s3526_s17 = sld [smem:[#allocation50_spill]]  ;;  %s901_s20 = scalar_lea.vmem [#allocation15], %s3205_s8 }
  0x72   : > { %p1022_p13 = scmp.lt.s32.totalorder %s3519_s21, 1  ;;  %s3252_s27 = scalar_lea.vmem [#allocation16], %s2064_s3 }
  0x73   : > { %p1030_p0 = scmp.lt.s32.totalorder %s3520_s7, 1  ;;  %s1021_s28 = scalar_lea.vmem [#allocation17], %s3193_s9 }
  0x74   : > { %s3555_s21 = smov (!%p1022_p13, %s3519_s21), 1  ;;  %p2075_p2 = scmp.ne.s32.totalorder %s3520_s7, 0 }
  0x75   : > { %s1031_s30 = scalar_select %p1030_p0, %s3520_s7, 1 }
  0x76   : > { %s2065_s26 = sshll.u32 %s3555_s21, 3  ;;  %s3524_s21 = sld [smem:[#allocation44_spill]] }
  0x77   : > { %s1025_s11 = scalar_lea.vmem %s3521_s16, %s2065_s26  ;;  %s3223_s13 = scalar_lea.vmem %s3522_s15, %s2065_s26 }
  0x78   : > { %s2144_s6 = sshll.u32 %s1031_s30, 4  ;;  %s2147_s19 = sshll.u32 %s1031_s30, 5 }
  0x79   : > { %s3228_s14 = scalar_lea.vmem %s3523_s12, %s2144_s6  ;;  %s3525_s16 = sld [smem:[#allocation48_spill]] }
  0x7a   : > { %s3243_s15 = scalar_lea.vmem %s3526_s17, %s2147_s19  ;;  %s847_s30 = scalar_lea.vmem [#allocation9], %s3205_s8 }
  0x7b   : > { %s874_s12 = scalar_lea.vmem [#allocation12], %s3205_s8  ;;  %1054 = sbr.rel (%p2075_p2) target bundleno = 398 (0x18e), region = 140 }
  0x7c   : > { %s3233_s25 = scalar_lea.vmem %s3524_s21, %s2144_s6  ;;  %s3527_s3 = sld [smem:[#allocation40_spill]] (!%p2075_p2) }
  0x7f   : > { %s3238_s2 = scalar_lea.vmem %s3525_s16, %s2144_s6 }
  0x80   : > { %v1055_v0 = vld [vmem:[%s1025_s11] sm:$0xff]  ;;  %vm1058_vm0 = vcmask 261120   ;;  %v2845_v2 = vmov 32.0   ;;  %v2335_v25 = vld [vmem:[#allocation6] ss:$0 sm:$0xff] }
  0x81   : > { %v1059_v1 = vsel %vm1058_vm0, %v1055_v0, 0.0  ;;  %2336 = vrcp.f32 %v2845_v2 }
  0x82   : > { %1060 = vadd.xlane.f32.xlu0 %v1059_v1  ;;  %v2334_v23 = vld [vmem:[%s3527_s3] ss:$0 sm:$0xff] }
  0x87   : > { %v2337_v3 = vpop.eup %2336 }
  0x88   : > { %v1063_v4 = vmul.f32 32.0, %v2337_v3  ;;  %vm1067_vm1 = vweird.f32 %v2337_v3 }
  0x8a   : > { %v1064_v5 = vsub.f32 1.0, %v1063_v4 }
  0x8c   : > { %v1065_v6 = vmul.f32 %v2337_v3, %v1064_v5 }
  0x8e   : > { %v1066_v7 = vadd.f32 %v2337_v3, %v1065_v6 }
  0x90   : > { %v1068_v8 = vsel %vm1067_vm1, %v2337_v3, %v1066_v7 }
  0xf5   : > { %v1061_v9 = vpop.xlane.xlu0 %1060 }
  0xf6   : > { %v1069_v10 = vmul.f32 %v1068_v8, %v1061_v9 }
  0xf8   : > { %v1070_v11 = vsub.f32 %v1055_v0, %v1069_v10 }
  0xfa   : > { %v1071_v12 = vmul.f32 %v1070_v11, %v1070_v11 }
  0xfc   : > { %v1072_v13 = vsel %vm1058_vm0, %v1071_v12, 0.0 }
  0xfd   : > { %1073 = vadd.xlane.f32.xlu0 %v1072_v13 }
 0x170   : > { %v1074_v14 = vpop.xlane.xlu0 %1073 }
 0x171   : > { %v1075_v15 = vmul.f32 %v1074_v14, %v1068_v8 }
 0x173   : > { %v1076_v16 = vadd.f32 1e-12, %v1075_v15 }
 0x175   : > { %2338 = vrsqrt.f32 %v1076_v16  ;;  %vm1083_vm3 = vweird.f32 %v1076_v16 }
 0x17b   : > { %v2339_v17 = vpop.eup %2338 }
 0x17c   : > { %v1078_v18 = vmul.f32 %v2339_v17, %v1076_v16  ;;  %vm1084_vm2 = vweird.f32 %v2339_v17 }
 0x17d   : > { %vm1085_vm4 = vmor %vm1083_vm3, %vm1084_vm2 }
 0x17e   : > { %v1079_v19 = vmul.f32 %v2339_v17, %v1078_v18 }
 0x180   : > { %v1080_v20 = vmul.f32 0.5, %v1079_v19 }
 0x182   : > { %v1081_v21 = vsub.f32 1.5, %v1080_v20 }
 0x184   : > { %v1082_v22 = vmul.f32 %v2339_v17, %v1081_v21 }
 0x186   : > { %v1086_v24 = vsel %vm1085_vm4, %v2339_v17, %v1082_v22 }
 0x187   : > { %v1087_v26 = vmul.f32 %v1086_v24, %v1070_v11 }
 0x189   : > { %v1091_v27 = vmul.f32 %v2334_v23, %v1087_v26 }
 0x18b   : > { %v1095_v28 = vadd.f32 %v2335_v25, %v1091_v27 }
 0x18d   : > { %1096 = vst.msk [vmem:[#allocation2] sm:$0xff] %vm1058_vm0, %v1095_v28 }
 0x18e PF: > { %v2149_v29 = vld [vmem:[%s3228_s14 + $0x8] sm:$0xff]  ;;  %v2148_v30 = vld [vmem:[%s3228_s14] sm:$0xff]  ;;  %vm1119_vm5 = vcmask 261120   ;;  %s3528_s11 = scalar_lea.vmem [#allocation8], %s3205_s8  ;;  %s2846_s6 = smov 104   ;;  %vm1159_vm6 = vcmask 64512  }
 0x18f   : > { %1129 = vmatpush.bf16.msra.mxu0 %v2149_v29  ;;  %v2340_v33 = vld [vmem:[%s3528_s11] ss:$0 sm:$0xff]  ;;  %s2847_s21 = smov 120   ;;  %s2848_s14 = smov 112   ;;  %vm1304_vm7 = vcmask 1043456   ;;  %vm1397_vm8 = vcmask 130048  }
 0x190   : > { %s2849_s0 = smov 96   ;;  %s3529_s5 = scalar_lea.vmem [#allocation3], %s3193_s9  ;;  %vm1399_vm9 = vcmask 195584   ;;  %vm1561_vm14 = vcmask 523264  }
 0x191   : > { %v2341_v62 = vld [vmem:[%s3529_s5] ss:$0 sm:$0xff]  ;;  %s2850_s16 = smov 64   ;;  %s2851_s1 = smov 16  }
 0x192   : > { %s2852_s26 = smov 8   ;;  %s2853_s17 = smov 24  }
 0x193   : > { %1130 = vmatpush.bf16.msra.mxu0 %v2148_v30 }
 0x194   : > { %v3264_v31 = vld [vmem:[#allocation2] sm:$0xff] }
 0x195   : > { %v1098_v32 = vpack.c.bf16 %v3264_v31, %v3264_v31 }
 0x197   : > { %2084 = vmatmul.msk.bf16.vlgmr.msra.gmra.mxu0 %vm1119_vm5, %v1098_v32 }
 0x214   : > { %v1132_v34 = vpop.f32.mrf.mxu0 }
 0x215   : > { %v1133_v35 = vadd.f32 %v2340_v33, %v1132_v34 }
 0x217   : > { %1143 = vrot.lane.b32.xlu1 %v1133_v35, %s2846_s6  ;;  %1137 = vrot.lane.b32.xlu0 %v1133_v35, %s2847_s21  ;;  %v1146_v37 = vpack.c.bf16 %v1133_v35, %v1133_v35 }
 0x219   : > { %v1155_v38 = vunpack.c.l.b16 %v1146_v37 }
 0x21b   : > { %v3271_v39 = vpack.c.b16 %v1155_v38, %v1155_v38 }
 0x21c   : > { %v1134_v36 = vpop.f32.mrf.mxu0 }
 0x21f   : > { %1140 = vrot.lane.b32.xlu0 %v1133_v35, %s2848_s14 }
 0x227   : > { %1157 = vrot.lane.b32.xlu0 %v3271_v39, %s2849_s0 }
 0x289   : > { %v1138_v40 = vpop.permute.xlu0 %1137  ;;  %v1144_v46 = vpop.permute.xlu1 %1143 }
 0x28a   : > { %v1147_v41 = vpack.c.bf16 %v1138_v40, %v1138_v40  ;;  %v1149_v48 = vpack.c.bf16 %v1144_v46, %v1144_v46 }
 0x28c   : > { %v1180_v42 = vunpack.c.l.b16 %v1147_v41  ;;  %v1228_v51 = vunpack.c.l.b16 %v1149_v48 }
 0x28e   : > { %v3274_v43 = vpack.c.b16 %v1180_v42, %v1180_v42  ;;  %v1229_v53 = vpack.c.b16 %v1228_v51, %v1228_v51 }
 0x290   : > { %1182 = vrot.lane.b32.xlu1 %v3274_v43, %s2849_s0 }
 0x291   : > { %v1141_v44 = vpop.permute.xlu0 %1140 }
 0x292   : > { %v1148_v45 = vpack.c.bf16 %v1141_v44, %v1141_v44 }
 0x294   : > { %v1204_v47 = vunpack.c.l.b16 %v1148_v45 }
 0x296   : > { %v3277_v49 = vpack.c.b16 %v1204_v47, %v1204_v47 }
 0x298   : > { %1206 = vrot.lane.b32.xlu2 %v3277_v49, %s2849_s0 }
 0x299   : > { %v1158_v50 = vpop.permute.xlu0 %1157 }
 0x29a   : > { %v1164_v52 = vsel %vm1159_vm6, %v1158_v50, 0 }
 0x29b   : > { %1173 = vmatpush.bf16.xpose.msra.mxu1 %v1164_v52 }
 0x2a0   : > { %1230 = vrot.lane.b32.xlu2 %v1229_v53, %s2849_s0 }
 0x2a2   : > { %2085 = vmatmul.msk.bf16.vlgmr.msra.gmra.mxu1 %vm1159_vm6, %v1146_v37 }
 0x2f2   : > { %v1207_v54 = vpop.permute.xlu2 %1206 }
 0x2f3   : > { %v1212_v55 = vsel %vm1159_vm6, %v1207_v54, 0 }
 0x2f4   : > { %1221 = vmatpush.bf16.xpose.msra.mxu3 %v1212_v55 }
 0x2fa   : > { %v1231_v56 = vpop.permute.xlu2 %1230 }
 0x2fb   : > { %2087 = vmatmul.msk.bf16.vlgmr.msra.gmra.mxu3 %vm1159_vm6, %v1148_v45  ;;  %v1236_v57 = vsel %vm1159_vm6, %v1231_v56, 0 }
 0x2fc   : > { %1245 = vmatpush.bf16.xpose.msrb.mxu0 %v1236_v57 }
 0x302   : > { %v1183_v58 = vpop.permute.xlu1 %1182 }
 0x303   : > { %2088 = vmatmul.msk.bf16.vlgmr.msrb.gmra.mxu0 %vm1159_vm6, %v1149_v48  ;;  %v1188_v59 = vsel %vm1159_vm6, %v1183_v58, 0 }
 0x304   : > { %1197 = vmatpush.bf16.xpose.msra.mxu2 %v1188_v59 }
 0x30b   : > { %2086 = vmatmul.msk.bf16.vlgmr.msra.gmra.mxu2 %vm1159_vm6, %v1147_v41 }
 0x31f   : > { %v1175_v60 = vpop.f32.mrf.mxu1 }
 0x320   : > { %v1176_v5 = vadd.f32 %v2341_v62, %v1175_v60 }
 0x322   : > { %v1251_v8 = vsel %vm1159_vm6, %v1176_v5, -inf }
 0x327   : > { %v1177_v61 = vpop.f32.mrf.mxu1 }
 0x37e   : > { %v1223_v63 = vpop.f32.mrf.mxu3 }
 0x37f   : > { %v1224_v0 = vadd.f32 %v2341_v62, %v1223_v63 }
 0x380   : > { %v1247_v1 = vpop.f32.mrf.mxu0 }
 0x381   : > { %v1248_v2 = vadd.f32 %v2341_v62, %v1247_v1  ;;  %v1257_v3 = vsel %vm1159_vm6, %v1224_v0, -inf }
 0x382   : > { %1258 = vmax.xlane.f32.xlu2 %v1257_v3  ;;  %v2150_v3 = vld [vmem:[%s3233_s25] sm:$0xff] }
 0x383   : > { %v1260_v4 = vsel %vm1159_vm6, %v1248_v2, -inf }
 0x384   : > { %1261 = vmax.xlane.f32.xlu0 %v1260_v4 }
 0x386   : > { %v1225_v6 = vpop.f32.mrf.mxu3 }
 0x388   : > { %v1249_v7 = vpop.f32.mrf.mxu0 }
 0x38a   : > { %1252 = vmax.xlane.f32.xlu2 %v1251_v8 }
 0x38e   : > { %v1199_v9 = vpop.f32.mrf.mxu2 }
 0x38f   : > { %v1200_v10 = vadd.f32 %v2341_v62, %v1199_v9 }
 0x391   : > { %v1254_v11 = vsel %vm1159_vm6, %v1200_v10, -inf }
 0x392   : > { %1255 = vmax.xlane.f32.xlu1 %v1254_v11  ;;  %v2342_v11 = vld [vmem:[%s847_s30] ss:$0 sm:$0xff] }
 0x396   : > { %v1201_v12 = vpop.f32.mrf.mxu2 }
 0x3f5   : > { %v1259_v13 = vpop.xlane.xlu2 %1258 }
 0x3f6   : > { %v1265_v14 = vsub.f32 %v1224_v0, %v1259_v13 }
 0x3f7   : > { %v1262_v15 = vpop.xlane.xlu0 %1261 }
 0x3f8   : > { %v1271_v16 = vmul.f32 1.442695, %v1265_v14  ;;  %v1266_v17 = vsub.f32 %v1248_v2, %v1262_v15  ;;  %v2151_v2 = vld [vmem:[%s3233_s25 + $0x8] sm:$0xff] }
 0x3fa   : > { %2349 = vpow2.f32 %v1271_v16  ;;  %v1273_v18 = vmul.f32 1.442695, %v1266_v17  ;;  %v2854_v17 = vmov 32.0  }
 0x3fc   : > { %2351 = vpow2.f32 %v1273_v18 }
 0x3fd   : > { %v1253_v28 = vpop.xlane.xlu2 %1252 }
 0x3fe   : > { %v1263_v29 = vsub.f32 %v1176_v5, %v1253_v28  ;;  %v2153_v28 = vld [vmem:[%s3238_s2 + $0x8] sm:$0xff] }
 0x400   : > { %v2350_v19 = vpop.eup %2349  ;;  %v1267_v30 = vmul.f32 1.442695, %v1263_v29  ;;  %v2152_v29 = vld [vmem:[%s3238_s2] sm:$0xff] }
 0x401   : > { %v1281_v20 = vsel %vm1159_vm6, %v2350_v19, 0.0 }
 0x402   : > { %v2352_v21 = vpop.eup %2351  ;;  %1282 = vadd.xlane.f32.xlu2 %v1281_v20 }
 0x403   : > { %v1284_v22 = vsel %vm1159_vm6, %v2352_v21, 0.0 }
 0x404   : > { %1285 = vadd.xlane.f32.xlu0 %v1284_v22 }
 0x405   : > { %v1256_v23 = vpop.xlane.xlu1 %1255 }
 0x406   : > { %v1264_v24 = vsub.f32 %v1200_v10, %v1256_v23 }
 0x408   : > { %v1269_v25 = vmul.f32 1.442695, %v1264_v24 }
 0x40a   : > { %2353 = vpow2.f32 %v1269_v25 }
 0x40b   : > { %2355 = vpow2.f32 %v1267_v30 }
 0x410   : > { %v2354_v26 = vpop.eup %2353 }
 0x411   : > { %v1278_v27 = vsel %vm1159_vm6, %v2354_v26, 0.0  ;;  %v2356_v32 = vpop.eup %2355 }
 0x412   : > { %1279 = vadd.xlane.f32.xlu1 %v1278_v27  ;;  %v1275_v33 = vsel %vm1159_vm6, %v2356_v32, 0.0 }
 0x418   : > { %1363 = vrot.lane.b32.xlu0 %v1229_v53, %s2850_s16 }
 0x41a   : > { %1342 = vrot.lane.b32.xlu2 %v3277_v49, %s2850_s16 }
 0x420   : > { %1299 = vrot.lane.b32.xlu0 %v3271_v39, %s2850_s16 }
 0x42b   : > { %1321 = vrot.lane.b32.xlu1 %v3274_v43, %s2850_s16 }
 0x455   : > { %1276 = vadd.xlane.f32.xlu1 %v1275_v33 }
 0x475   : > { %v1283_v34 = vpop.xlane.xlu2 %1282 }
 0x476   : > { %2357 = vrcp.f32 %v1283_v34 }
 0x477   : > { %v1286_v37 = vpop.xlane.xlu0 %1285 }
 0x478   : > { %2359 = vrcp.f32 %v1286_v37 }
 0x47c   : > { %v2358_v35 = vpop.eup %2357 }
 0x47d   : > { %v1293_v36 = vmul.f32 %v2358_v35, %v2350_v19  ;;  %v1343_v38 = vpop.permute.xlu2 %1342 }
 0x47e   : > { %v1348_v40 = vsel %vm1304_vm7, %v1343_v38, 0  ;;  %v2360_v41 = vpop.eup %2359 }
 0x47f   : > { %1357 = vmatpush.bf16.msrb.mxu3 %v1348_v40  ;;  %v1297_v39 = vpack.c.bf16 %v1293_v36, %v1293_v36  ;;  %v1294_v42 = vmul.f32 %v2360_v41, %v2352_v21 }
 0x481   : > { %v1298_v45 = vpack.c.bf16 %v1294_v42, %v1294_v42  ;;  %v2344_v42 = vld [vmem:[%s865_s10] ss:$0 sm:$0xff] }
 0x482   : > { %2091 = vmatmul.msk.bf16.vlgmr.msrb.gmra.mxu3 %vm1159_vm6, %v1297_v39  ;;  %v2343_v39 = vld [vmem:[%s856_s23] ss:$0 sm:$0xff]  ;;  %s3530_s23 = sld [smem:[#allocation28_spill]] }
 0x485   : > { %v1280_v46 = vpop.xlane.xlu1 %1279 }
 0x486   : > { %2361 = vrcp.f32 %v1280_v46 }
 0x488   : > { %p2128_p4 = scmp.ne.s32.totalorder %s3530_s23, 1 }
 0x489   : > { %s3532_s10 = sld [smem:[#allocation55_spill]] (!%p2128_p4) }
 0x48a   : > { %v1364_v43 = vpop.permute.xlu0 %1363 }
 0x48b   : > { %v1369_v44 = vsel %vm1304_vm7, %v1364_v43, 0 }
 0x48c   : > { %1378 = vmatpush.bf16.msra.mxu0 %v1369_v44  ;;  %v2362_v49 = vpop.eup %2361 }
 0x48d   : > { %v1292_v50 = vmul.f32 %v2362_v49, %v2354_v26  ;;  %v2155_v49 = vld [vmem:[%s3243_s15 + $0x8] sm:$0xff] }
 0x48f   : > { %2092 = vmatmul.msk.bf16.vlgmr.msra.gmra.mxu0 %vm1159_vm6, %v1298_v45  ;;  %v1296_v53 = vpack.c.bf16 %v1292_v50, %v1292_v50  ;;  %v2154_v50 = vld [vmem:[%s3243_s15] sm:$0xff] }
 0x492   : > { %v1300_v47 = vpop.permute.xlu0 %1299 }
 0x493   : > { %v1306_v48 = vsel %vm1304_vm7, %v1300_v47, 0  ;;  %v2157_v47 = vld [vmem:[%s3243_s15 + $0x18] sm:$0xff] }
 0x494   : > { %1315 = vmatpush.bf16.msrb.mxu1 %v1306_v48  ;;  %1569 = vmatpush.bf16.msra.mxu3 %v2157_v47  ;;  %v2156_v48 = vld [vmem:[%s3243_s15 + $0x10] sm:$0xff]  ;;  %s3531_s15 = sld [smem:[#allocation54_spill]] (!%p2128_p4) }
 0x498   : > { %1431 = vmatpush.bf16.msra.mxu1 %v2151_v2  ;;  %1570 = vmatpush.bf16.msra.mxu3 %v2156_v48 }
 0x49c   : > { %1432 = vmatpush.bf16.msra.mxu1 %v2150_v3  ;;  %1571 = vmatpush.bf16.msra.mxu3 %v2155_v49 }
 0x49d   : > { %v1322_v51 = vpop.permute.xlu1 %1321 }
 0x49e   : > { %v1327_v52 = vsel %vm1304_vm7, %v1322_v51, 0  ;;  %v2345_v51 = vld [vmem:[%s874_s12] ss:$0 sm:$0xff] }
 0x49f   : > { %1336 = vmatpush.bf16.msrb.mxu2 %v1327_v52 }
 0x4a0   : > { %1572 = vmatpush.bf16.msra.mxu3 %v2154_v50 }
 0x4a2   : > { %2090 = vmatmul.msk.bf16.vlgmr.msrb.gmra.mxu2 %vm1159_vm6, %v1296_v53 }
 0x4a3   : > { %1508 = vmatpush.bf16.msra.mxu2 %v2153_v28 }
 0x4a7   : > { %1509 = vmatpush.bf16.msra.mxu2 %v2152_v29 }
 0x4c8   : > { %v1277_v54 = vpop.xlane.xlu1 %1276 }
 0x4c9   : > { %2363 = vrcp.f32 %v1277_v54 }
 0x4ca   : > { %2365 = vrcp.f32 %v2854_v17 }
 0x4cf   : > { %v2364_v55 = vpop.eup %2363 }
 0x4d0   : > { %v1291_v56 = vmul.f32 %v2364_v55, %v2356_v32  ;;  %v2366_v18 = vpop.eup %2365 }
 0x4d1   : > { %v1445_v19 = vmul.f32 32.0, %v2366_v18  ;;  %vm1449_vm10 = vweird.f32 %v2366_v18 }
 0x4d2   : > { %v1295_v57 = vpack.c.bf16 %v1291_v56, %v1291_v56 }
 0x4d3   : > { %v1446_v20 = vsub.f32 1.0, %v1445_v19 }
 0x4d4   : > { %2089 = vmatmul.msk.bf16.vlgmr.msrb.gmra.mxu1 %vm1159_vm6, %v1295_v57 }
 0x4d5   : > { %v1447_v21 = vmul.f32 %v2366_v18, %v1446_v20 }
 0x4d7   : > { %v1448_v22 = vadd.f32 %v2366_v18, %v1447_v21  ;;  %v2347_v21 = vld [vmem:[%s892_s22] ss:$0 sm:$0xff] }
 0x4d9   : > { %v3317_v23 = vsel %vm1449_vm10, %v2366_v18, %v1448_v22 }
 0x505   : > { %v1359_v58 = vpop.f32.mrf.mxu3 }
 0x506   : > { %1389 = vrot.lane.b32.xlu0 %v1359_v58, %s2851_s1 }
 0x50c   : > { %v1380_v59 = vpop.f32.mrf.mxu0 }
 0x50d   : > { %v1361_v60 = vpop.f32.mrf.mxu3 }
 0x514   : > { %v1382_v61 = vpop.f32.mrf.mxu0 }
 0x525   : > { %v1338_v62 = vpop.f32.mrf.mxu2 }
 0x526   : > { %1385 = vrot.lane.b32.xlu2 %v1338_v62, %s2852_s26 }
 0x52d   : > { %v1340_v63 = vpop.f32.mrf.mxu2 }
 0x52e   : > { %1393 = vrot.lane.b32.xlu2 %v1380_v59, %s2853_s17 }
 0x551   : > { %v1317_v0 = vpop.f32.mrf.mxu1 }
 0x559   : > { %v1319_v1 = vpop.f32.mrf.mxu1 }
 0x55a   : > { %v2346_v1 = vld [vmem:[%s883_s18] ss:$0 sm:$0xff] }
 0x578   : > { %v1390_v6 = vpop.permute.xlu0 %1389 }
 0x580   : > { %v1386_v4 = vpop.permute.xlu2 %1385 }
 0x581   : > { %v1396_v5 = vsel %vm1159_vm6, %v1317_v0, %v1386_v4 }
 0x582   : > { %v1398_v8 = vsel %vm1397_vm8, %v1396_v5, %v1390_v6 }
 0x588   : > { %v1394_v7 = vpop.permute.xlu2 %1393 }
 0x589   : > { %v1400_v9 = vsel %vm1399_vm9, %v1398_v8, %v1394_v7 }
 0x58a   : > { %v1401_v10 = vpack.c.bf16 %v1400_v9, %v1400_v9 }
 0x58c   : > { %2101 = vmatmul.msk.bf16.vlgmr.msra.gmra.mxu1 %vm1119_vm5, %v1401_v10 }
 0x609   : > { %v1434_v12 = vpop.f32.mrf.mxu1 }
 0x60a   : > { %v1435_v13 = vadd.f32 %v2342_v11, %v1434_v12 }
 0x60c   : > { %v1438_v14 = vadd.f32 %v1435_v13, %v3264_v31 }
 0x60e   : > { %v1441_v15 = vsel %vm1119_vm5, %v1438_v14, 0.0 }
 0x60f   : > { %1442 = vadd.xlane.f32.xlu0 %v1441_v15 }
 0x611   : > { %v1436_v16 = vpop.f32.mrf.mxu1 }
 0x682   : > { %v1443_v24 = vpop.xlane.xlu0 %1442 }
 0x683   : > { %v1451_v25 = vmul.f32 %v3317_v23, %v1443_v24  ;;  %v2348_v24 = vld [vmem:[%s901_s20] ss:$0 sm:$0xff] }
 0x685   : > { %v1452_v31 = vsub.f32 %v1438_v14, %v1451_v25 }
 0x687   : > { %v1453_v26 = vmul.f32 %v1452_v31, %v1452_v31 }
 0x689   : > { %v1454_v27 = vsel %vm1119_vm5, %v1453_v26, 0.0 }
 0x68a   : > { %1455 = vadd.xlane.f32.xlu2 %v1454_v27 }
 0x6fd   : > { %v1456_v30 = vpop.xlane.xlu2 %1455 }
 0x6fe   : > { %v1457_v32 = vmul.f32 %v1456_v30, %v3317_v23 }
 0x700   : > { %v1458_v33 = vadd.f32 1e-12, %v1457_v32 }
 0x702   : > { %2367 = vrsqrt.f32 %v1458_v33  ;;  %vm1465_vm12 = vweird.f32 %v1458_v33 }
 0x708   : > { %v2368_v34 = vpop.eup %2367 }
 0x709   : > { %v1460_v35 = vmul.f32 %v2368_v34, %v1458_v33  ;;  %vm1466_vm11 = vweird.f32 %v2368_v34 }
 0x70a   : > { %vm1467_vm13 = vmor %vm1465_vm12, %vm1466_vm11 }
 0x70b   : > { %v1461_v36 = vmul.f32 %v2368_v34, %v1460_v35 }
 0x70d   : > { %v1462_v37 = vmul.f32 0.5, %v1461_v36 }
 0x70f   : > { %v1463_v38 = vsub.f32 1.5, %v1462_v37 }
 0x711   : > { %v1464_v40 = vmul.f32 %v2368_v34, %v1463_v38 }
 0x713   : > { %v1468_v41 = vsel %vm1467_vm13, %v2368_v34, %v1464_v40 }
 0x714   : > { %v1469_v43 = vmul.f32 %v1468_v41, %v1452_v31 }
 0x716   : > { %v1473_v44 = vmul.f32 %v2343_v39, %v1469_v43 }
 0x718   : > { %v1477_v45 = vadd.f32 %v2344_v42, %v1473_v44 }
 0x71a   : > { %v1478_v46 = vpack.c.bf16 %v1477_v45, %v1477_v45 }
 0x71c   : > { %2110 = vmatmul.msk.bf16.vlgmr.msra.gmra.mxu2 %vm1119_vm5, %v1478_v46 }
 0x79f   : > { %v1511_v52 = vpop.f32.mrf.mxu2 }
 0x7a0   : > { %v1512_v53 = vadd.f32 %v2345_v51, %v1511_v52 }
 0x7a2   : > { %v1516_v54 = vmul.f32 0.044715, %v1512_v53  ;;  %v1515_v61 = vmul.f32 0.5, %v1512_v53 }
 0x7a4   : > { %v1517_v55 = vmul.f32 %v1516_v54, %v1512_v53 }
 0x7a6   : > { %v1518_v56 = vmul.f32 %v1517_v55, %v1512_v53 }
 0x7a7   : > { %v1513_v57 = vpop.f32.mrf.mxu2 }
 0x7a8   : > { %v1519_v58 = vadd.f32 %v1518_v56, %v1512_v53 }
 0x7aa   : > { %v1520_v59 = vmul.f32 0.7978846, %v1519_v58 }
 0x7ac   : > { %2369 = vtanh.f32 %v1520_v59 }
 0x7b2   : > { %v2370_v60 = vpop.eup %2369 }
 0x7b3   : > { %v1522_v62 = vadd.f32 1.0, %v2370_v60 }
 0x7b5   : > { %v1523_v63 = vmul.f32 %v1522_v62, %v1515_v61 }
 0x7b7   : > { %v1524_v0 = vpack.c.bf16 %v1523_v63, %v1523_v63 }
 0x7b9   : > { %2127 = vmatmul.msk.bf16.vlgmr.msra.gmra.mxu3 %vm1561_vm14, %v1524_v0 }
 0x83c   : > { %v1574_v2 = vpop.f32.mrf.mxu3 }
 0x83d   : > { %v1575_v3 = vadd.f32 %v2346_v1, %v1574_v2 }
 0x83f   : > { %v1578_v4 = vadd.f32 %v1575_v3, %v1477_v45 }
 0x841   : > { %v1581_v5 = vsel %vm1119_vm5, %v1578_v4, 0.0 }
 0x842   : > { %1582 = vadd.xlane.f32.xlu1 %v1581_v5 }
 0x844   : > { %v1576_v6 = vpop.f32.mrf.mxu3 }
 0x8b5   : > { %v1583_v7 = vpop.xlane.xlu1 %1582 }
 0x8b6   : > { %v1584_v8 = vmul.f32 %v1583_v7, %v3317_v23 }
 0x8b8   : > { %v1585_v9 = vsub.f32 %v1578_v4, %v1584_v8 }
 0x8ba   : > { %v1586_v10 = vmul.f32 %v1585_v9, %v1585_v9 }
 0x8bc   : > { %v1587_v11 = vsel %vm1119_vm5, %v1586_v10, 0.0 }
 0x8bd   : > { %1588 = vadd.xlane.f32.xlu1 %v1587_v11 }
 0x930   : > { %v1589_v12 = vpop.xlane.xlu1 %1588 }
 0x931   : > { %v1590_v13 = vmul.f32 %v1589_v12, %v3317_v23 }
 0x933   : > { %v1591_v14 = vadd.f32 1e-12, %v1590_v13 }
 0x935   : > { %2371 = vrsqrt.f32 %v1591_v14  ;;  %vm1598_vm0 = vweird.f32 %v1591_v14 }
 0x93b   : > { %v2372_v15 = vpop.eup %2371 }
 0x93c   : > { %v1593_v16 = vmul.f32 %v2372_v15, %v1591_v14  ;;  %vm1599_vm15 = vweird.f32 %v2372_v15 }
 0x93d   : > { %vm1600_vm1 = vmor %vm1598_vm0, %vm1599_vm15 }
 0x93e   : > { %v1594_v17 = vmul.f32 %v2372_v15, %v1593_v16 }
 0x940   : > { %v1595_v18 = vmul.f32 0.5, %v1594_v17 }
 0x942   : > { %v1596_v19 = vsub.f32 1.5, %v1595_v18 }
 0x944   : > { %v1597_v20 = vmul.f32 %v2372_v15, %v1596_v19 }
 0x946   : > { %v1601_v22 = vsel %vm1600_vm1, %v2372_v15, %v1597_v20 }
 0x947   : > { %v1602_v25 = vmul.f32 %v1601_v22, %v1585_v9 }
 0x949   : > { %v1606_v31 = vmul.f32 %v2347_v21, %v1602_v25  ;;  %1615 = sbr.rel (%p2128_p4) target bundleno = 3085 (0xc0d), region = 144 }
 0x94b   : > { %v1610_v26 = vadd.f32 %v2348_v24, %v1606_v31 }
 0x94d   : > { %1611 = vst.msk [vmem:[#allocation2] sm:$0xff] %vm1119_vm5, %v1610_v26 }
 0x94e   : > { %v2159_v23 = vld [vmem:[%s3531_s15 + $0x8] sm:$0xff]  ;;  %v2158_v27 = vld [vmem:[%s3531_s15] sm:$0xff]  ;;  %v1616_v28 = vpack.c.bf16 %v1610_v26, %v1610_v26  ;;  %v2855_v35 = vmov 0   ;;  %v2856_v39 = vmov 0.0   ;;  %v1655_v43 = vlaneseq }
 0x94f   : > { %1646 = vmatpush.bf16.msra.mxu0 %v2159_v23  ;;  %v2375_v29 = vld [vmem:[%s3532_s10] ss:$0 sm:$0xff]  ;;  %2373 = vset.pattern.permute.xlu1 %v2855_v35  ;;  %vm1681_vm4 = vcmask 7168  }
 0x950   : > { %v1654_v34 = vld [vmem:[%s3223_s13] sm:$0xff]  ;;  %2374 = vset.pattern.permute.xlu0 %v2855_v35  ;;  %v1656_v44 = vand.u32 127, %v1655_v43 }
 0x951   : > { %1658 = vperm.xlu1 %2373, %v1654_v34   ;;  %vm1677_vm2 = vcmp.ne.s32.totalorder %v1654_v34, 4294967196 }
 0x952   : > { %v2139_v41 = vsel %vm1677_vm2, 1.0, %v2856_v39  ;;  %vm1702_vm6 = vcmp.eq.s32.totalorder %v1656_v44, 0 }
 0x953   : > { %1647 = vmatpush.bf16.msra.mxu0 %v2158_v27  ;;  %v1692_v55 = vsel %vm1681_vm4, %v2139_v41, 0.0 }
 0x956   : > { %2137 = vmatmul.msk.bf16.vlgmr.msra.gmra.mxu0 %vm1119_vm5, %v1616_v28  ;;  %vm1703_vm5 = vcmp.eq.s32.totalorder %v1656_v44, 1 }
 0x9c3   : > { %v1659_v45 = vpop.permute.xlu1 %1658 }
 0x9c4   : > { %vm1660_vm3 = vcmp.eq.s32.totalorder %v1656_v44, %v1659_v45 }
 0x9c5   : > { %v2138_v49 = vsel %vm1660_vm3, 1.0, %v2856_v39 }
 0x9d3   : > { %v1649_v30 = vpop.f32.mrf.mxu0 }
 0x9d4   : > { %v1650_v32 = vadd.f32 %v2375_v29, %v1649_v30 }
 0x9d6   : > { %1653 = vst [vmem:[%s3252_s27] sm:$0xff] %v1650_v32  ;;  %1663 = vmax.xlane.f32.xlu0 %v1650_v32 }
 0x9db   : > { %v1651_v33 = vpop.f32.mrf.mxu0 }
 0xa49   : > { %v1664_v36 = vpop.xlane.xlu0 %1663 }
 0xa4a   : > { %v1665_v37 = vsub.f32 %v1650_v32, %v1664_v36 }
 0xa4c   : > { %v1666_v38 = vmul.f32 1.442695, %v1665_v37 }
 0xa4e   : > { %2376 = vpow2.f32 %v1666_v38 }
 0xa54   : > { %v2377_v40 = vpop.eup %2376 }
 0xa55   : > { %1668 = vadd.xlane.f32.xlu0 %v2377_v40 }
 0xac8   : > { %v1669_v42 = vpop.xlane.xlu0 %1668 }
 0xac9   : > { %2378 = vlog2.f32 %v1669_v42 }
 0xacf   : > { %v2379_v46 = vpop.eup %2378 }
 0xad0   : > { %v1671_v47 = vmul.f32 0.6931472, %v2379_v46 }
 0xad2   : > { %v1672_v48 = vadd.f32 %v1671_v47, %v1664_v36 }
 0xad4   : > { %v1673_v50 = vsub.f32 %v1650_v32, %v1672_v48 }
 0xad6   : > { %v1674_v51 = vmul.f32 %v2138_v49, %v1673_v50 }
 0xad8   : > { %1675 = vadd.xlane.f32.xlu1 %v1674_v51 }
 0xb4b   : > { %v1676_v52 = vpop.xlane.xlu1 %1675 }
 0xb4c   : > { %v1680_v53 = vmul.f32 %v2139_v41, %v1676_v52 }
 0xb4e   : > { %v1682_v54 = vsel %vm1681_vm4, %v1680_v53, 0.0 }
 0xb4f   : > { %1683 = vadd.xlane.f32.xlu2 %v1682_v54 }
 0xb57   : > { %1693 = vadd.xlane.f32.xlu2 %v1692_v55 }
 0xbc2   : > { %v1684_v56 = vpop.xlane.xlu2 %1683 }
 0xbc3   : > { %v1685_v57 = vrot.slane %v1684_v56, 4 }
 0xbc5   : > { %v1686_v58 = vadd.f32 %v1685_v57, %v1684_v56 }
 0xbc7   : > { %v1687_v59 = vrot.slane %v1686_v58, 2 }
 0xbc9   : > { %v1688_v60 = vadd.f32 %v1687_v59, %v1686_v58 }
 0xbca   : > { %v1694_v61 = vpop.xlane.xlu2 %1693 }
 0xbcb   : > { %v1695_v62 = vrot.slane %v1694_v61, 4  ;;  %v1689_v63 = vrot.slane %v1688_v60, 1 }
 0xbcd   : > { %v1696_v0 = vadd.f32 %v1695_v62, %v1694_v61  ;;  %v1690_v1 = vadd.f32 %v1689_v63, %v1688_v60 }
 0xbcf   : > { %v1697_v2 = vrot.slane %v1696_v0, 2  ;;  %2160 = vpush %v1690_v1 }
 0xbd1   : > { %v1698_v3 = vadd.f32 %v1697_v2, %v1696_v0 }
 0xbd3   : > { %v1699_v4 = vrot.slane %v1698_v3, 1 }
 0xbd5   : > { %v1700_v5 = vadd.f32 %v1699_v4, %v1698_v3 }
 0xbd7   : > { %2162 = vpush %v1700_v5 }
 0xc00   : > { %s2161_s13 = spop %2160 }
 0xc01   : > { %v1706_v7 = vstv %s2161_s13 }
 0xc08   : > { %s2163_s12 = spop %2162 }
 0xc09   : > { %v1704_v6 = vstv %s2163_s12 }
 0xc0a   : > { %v1705_v8 = vsel %vm1703_vm5, %v1704_v6, 0.0 }
 0xc0b   : > { %v1707_v9 = vsel %vm1702_vm6, %v1706_v7, %v1705_v8 }
 0xc0c   : > { %1708 = vst [vmem:[%s1021_s28] sm:$0x1] %v1707_v9 }
 0xc0d PF: > { %s3533_s18 = sld [smem:[#allocation29_spill]]  ;;  %s1726_s21 = sshll.u32 %s3252_s27, 4  ;;  %s1727_s21 = int_to_ptr.vmem [resolvable:$true] %s1726_s21 }
 0xc0e   : > { %s3534_s11 = sld [smem:[#allocation56_spill]]  ;;  %s1710_s0 = scalar_lea.sflag [#allocation5], %s3193_s9 }
 0xc13   : > { %s2141_s19 = sshll.u32 %s3533_s18, 3 }
 0xc14   : > { %s1724_s6 = scalar_lea.hbm %s3534_s11, %s2141_s19  ;;  %s2700_s17 = scalar_lea.hbm %s3534_s11, 16 }
 0xc15   : > { %s1728_s14 = sshll.u32 %s1724_s6, 4  ;;  %s1729_s14 = int_to_ptr.hbm [resolvable:$true] %s1728_s14 }
 0xc16   : > { %s2694_s5 = sshra.s32 %s1729_s14, 4  ;;  %s2695_s5 = int_to_ptr.hbm [resolvable:$true] %s2694_s5 }
 0xc17   : > { %s2696_s16 = scalar_lea.hbm %s2695_s5, 8  ;;  %p2701_p8 = scmp.lt.s32.totalorder %s2695_s5, %s3534_s11 }
 0xc18   : > { %p2697_p5 = scmp.ne.s32.totalorder %s2695_s5, %s2696_s16  ;;  %p2702_p10 = scmp.lt.s32.totalorder %s2700_s17, %s2696_s16 }
 0xc1a   : > { %p2698_p6 = pnand %p2697_p5, %p3165_p9  ;;  %p2703_p3 = por %p2702_p10, %p2701_p8 }
 0xc1c   : > { %p2699_p7 = pneg %p2698_p6 }
 0xc1e   : > { %p2704_p12 = pnand %p2703_p3, %p2699_p7 }
 0xc20   : > { %2707 = shalt.err (!%p2704_p12)
}
 0xc21   : > { %2186 = dma.vmem_to_hbm [thread:$0]  (%p3165_p9), %s1727_s21, 128, %s1729_s14, %s1710_s0  }
 0xc22   : > { %s3535_s22 = sld [smem:[#allocation57_spill]]  ;;  %s1739_s8 = sshll.u32 %s1021_s28, 4  ;;  %s1740_s8 = int_to_ptr.vmem [resolvable:$true] %s1739_s8 }
 0xc23   : > { %s1715_s13 = scalar_lea.sflag [#allocation18], %s3193_s9 }
 0xc28   : > { %s3536_s30 = smov %s3535_s22  ;;  %s1737_s20 = scalar_lea.hbm %s3535_s22, %s3533_s18 }
 0xc29   : > { %s1741_s10 = sshll.u32 %s1737_s20, 4  ;;  %s2728_s6 = scalar_lea.hbm %s3536_s30, 2  ;;  %s1742_s10 = int_to_ptr.hbm [resolvable:$true] %s1741_s10 }
 0xc2a   : > { %s2722_s12 = sshra.s32 %s1742_s10, 4  ;;  %s2723_s12 = int_to_ptr.hbm [resolvable:$true] %s2722_s12 }
 0xc2b   : > { %s2724_s19 = scalar_lea.hbm %s2723_s12, 1  ;;  %p2729_p2 = scmp.lt.s32.totalorder %s2723_s12, %s3536_s30 }
 0xc2c   : > { %p2725_p1 = scmp.ne.s32.totalorder %s2723_s12, %s2724_s19  ;;  %p2730_p4 = scmp.lt.s32.totalorder %s2728_s6, %s2724_s19 }
 0xc2e   : > { %p2726_p13 = pnand %p2725_p1, %p3165_p9  ;;  %p2731_p5 = por %p2730_p4, %p2729_p2 }
 0xc30   : > { %p2727_p0 = pneg %p2726_p13 }
 0xc32   : > { %p2732_p6 = pnand %p2731_p5, %p2727_p0 }
 0xc34   : > { %2735 = shalt.err (!%p2732_p6)
}
 0xc35   : > { %2187 = dma.vmem_to_hbm [thread:$0]  (%p3165_p9), %s1740_s8, 16, %s1742_s10, %s1715_s13  }
 0xc36 PF: > { %p2232_p7 = scmp.ge.s32.totalorder %s2842_s4, 2  ;;  %s1753_s28 = sand.u32 1, %s2814_s24  }
 0xc37   : > { %s1754_s18 = scalar_lea.sflag [#allocation5], %s1753_s28 }
 0xc38   : > { %p2223_p8 = pnand %p2232_p7, %p3058_p11 }
 0xc3a   : > { %p2224_p10 = pneg %p2223_p8 }
 0xc3c   : > { %2793 = dma.done.wait (%p2224_p10), %s1754_s18, 128  }
 0xc3d   : > { %2795 = vsyncadd (%p2224_p10), %s1754_s18, 4294967168  ;;  %s1764_s0 = scalar_lea.sflag [#allocation18], %s1753_s28 }
 0xc3e   : > { %2797 = dma.done.wait (%p2224_p10), %s1764_s0, 16  }
 0xc3f   : > { %2799 = vsyncadd (%p2224_p10), %s1764_s0, 4294967280  ;;  %s41_s4 = sadd.s32 1, %s2842_s4   ;;  %s3538_s1 = sld [smem:[#allocation24_spill]] }
 0xc40   : > { %p38_p3 = scmp.ge.s32.totalorder %s41_s4, 6   ;;  %s3539_s22 = sld [smem:[#allocation25_spill]] }
 0xc41   : > { %s3540_s23 = sld [smem:[#allocation34_spill]] }
 0xc42   : > { %s3541_s24 = sld [smem:[#allocation26_spill]] }
 0xc43   : > { %s3542_s2 = sld [smem:[#allocation27_spill]] }
 0xc44   : > { %s3543_s25 = sld [smem:[#allocation35_spill]]  ;;  %40 = sbr.rel (!%p38_p3) target bundleno = 34 (0x22), region = 276 }
 0xc45   : > { %s3544_s3 = sld [smem:[#allocation30_spill]] }
 0xc46   : > { %s3545_s26 = sld [smem:[#allocation31_spill]] }
 0xc47   : > { %s3546_s27 = sld [smem:[#allocation32_spill]] }
 0xc48   : > { %s3547_s28 = sld [smem:[#allocation33_spill]] }
 0xc49   :  { %1769 = vsyncpa [#allocation4], 1 }
 0xc4a   :  { %1771 = vsyncpa [#allocation4 + $0x1], 1 }
 0xc4b   :  { %1772 = vsyncpa [#allocation7], 1 }
 0xc4c   :  { %1773 = vsyncpa [#allocation5], 1 }
 0xc4d   :  { %1775 = vsyncpa [#allocation5 + $0x1], 1 }
 0xc4e   :  { %1776 = vsyncpa [#allocation18], 1 }
 0xc4f   :  { %1778 = vsyncpa [#allocation18 + $0x1], 1 }

</bundles_post_ra>
